<compile_context>
chip_gen: v6e
topology: v6e:2x2x1
jax: 0.10.0
libtpu: 0.0.40
codegen_flags: <defaults>
</compile_context>

<pallas_src>
import functools

import numpy as np
import jax
import jax.numpy as jnp
from jax.experimental import pallas as pl
from jax.experimental.pallas import tpu as pltpu


def _round_up(x, m):
    return ((x + m - 1) // m) * m


# ---------------------------------------------------------------------------
# Fused forward kernel: grid axis = assignment step n (n = program_id + 1)
# ---------------------------------------------------------------------------

def _fused_forward_kernel(
    # scalar prefetch (SMEM)
    cs_sref, K_sref,
    # VMEM inputs (constant index maps -> resident for the whole grid)
    cs_ref, data_ref,
    wh1, bh1, wh2, bh2,          # h encoder
    wq1, bq1, wq2, bq2,          # q encoder
    wg1, we1h,                   # step-0 loop-invariant projections
    bg1t, wg2blk, bg2t,          # g backbone (batch-on-lanes layout)
    we1gblk, be1t, we2blk,       # E backbone (no last-layer bias)
    # output (written once, at the last step)
    out_ref,
    # VMEM scratch (persists across grid steps)
    hW_ref, qW_ref, kl_ref, pred_ref,
    *, B, N, Kmax, R1p, K1p):
    f32 = jnp.float32
    BH = hW_ref.shape[1]         # B * H_dim

    step = pl.program_id(0)
    n = step + 1                 # point being assigned at this step
    Kn = K_sref[n]               # number of existing clusters at step n
    c = cs_sref[n]               # ground-truth assignment of point n

    # ---- step 0: encode once; hoist loop-invariant projections; zero carries ---
    @pl.when(step == 0)
    def _init():
        x = data_ref[...]                                             # [B*N, x_dim]
        hh = jnp.maximum(jnp.dot(x, wh1[...], preferred_element_type=f32) + bh1[...], 0.0)
        hs = jnp.dot(hh, wh2[...], preferred_element_type=f32) + bh2[...]
        qq = jnp.maximum(jnp.dot(x, wq1[...], preferred_element_type=f32) + bq1[...], 0.0)
        qs = jnp.dot(qq, wq2[...], preferred_element_type=f32) + bq2[...]
        # batch-on-lanes layout: column block b*H:(b+1)*H holds batch b.
        hW_ref[...] = jnp.concatenate(
            [jnp.dot(hs[b * N:(b + 1) * N, :], wg1[...], preferred_element_type=f32)
             for b in range(B)], axis=1)                              # [N, B*H]
        qW_ref[...] = jnp.concatenate(
            [jnp.dot(qs[b * N:(b + 1) * N, :], we1h[...], preferred_element_type=f32)
             for b in range(B)], axis=1)                              # [N, B*H]
        kl_ref[...] = jnp.zeros_like(kl_ref)
        pred_ref[...] = jnp.zeros_like(pred_ref)

    # ---- build selection matrices in-kernel (VPU compares on iota) -------------
    # M [R1p, N]: rows 0..Kmax-1 -> cluster-k sums, rows Kmax..2Kmax-1 -> +point n,
    #             row 2Kmax -> point n alone.  Padded rows never selected by S.
    pt = jax.lax.broadcasted_iota(jnp.int32, (R1p, N), 1)
    kr = jax.lax.broadcasted_iota(jnp.int32, (R1p, N), 0)
    cs_b = jnp.broadcast_to(cs_ref[...], (R1p, N))
    cs_v = jnp.where(pt < n, cs_b, -1)                    # points >= n unassigned
    k_eff = jnp.where(kr < Kmax, kr, kr - Kmax)
    M = jnp.logical_or(cs_v == k_eff,
                       jnp.logical_and(kr >= Kmax, pt == n)).astype(f32)

    # S [K1p, R1p]: which g(H) rows sum into each candidate-cluster energy.
    rr = jax.lax.broadcasted_iota(jnp.int32, (K1p, R1p), 0)
    cc = jax.lax.broadcasted_iota(jnp.int32, (K1p, R1p), 1)
    S = (((rr < Kn) & (cc < Kn) & (cc != rr))
         | ((rr < Kn) & (cc == rr + Kmax))
         | ((rr == Kn) & (cc < Kn))
         | ((rr == Kn) & (cc == 2 * Kmax))).astype(f32)

    # Unassigned-points mask for Q = sum_{i>n} qs_i.
    u_pt = jax.lax.broadcasted_iota(jnp.int32, (1, N), 1)
    mask_u = (u_pt > n).astype(f32)                       # [1, N]

    # ---- per-step pipeline: batch on lanes, single 2-D matmuls -----------------
    gpre = jnp.dot(M, hW_ref[...], preferred_element_type=f32) + bg1t[...]   # [R1p, B*H]
    gh = jnp.maximum(gpre, 0.0)
    gs = jnp.dot(gh, wg2blk[...], preferred_element_type=f32) + bg2t[...]    # [R1p, B*g]
    G = jnp.dot(S, gs, preferred_element_type=f32)                           # [K1p, B*g]
    Q = jnp.dot(mask_u, qW_ref[...], preferred_element_type=f32)             # [1,   B*H]
    e_pre = (jnp.dot(G, we1gblk[...], preferred_element_type=f32)
             + jnp.broadcast_to(Q, (K1p, BH)) + be1t[...])                   # [K1p, B*H]
    eh = jnp.maximum(e_pre, 0.0)
    E_kb = jnp.dot(eh, we2blk[...], preferred_element_type=f32)              # [K1p, B]

    # ---- masked log_softmax(-E) over the (padded) cluster options --------------
    krow = jax.lax.broadcasted_iota(jnp.int32, (K1p, B), 0)
    valid = krow <= Kn                                     # options 0..Kn are real
    negE = jnp.where(valid, -E_kb, -1e30)
    m = jnp.max(negE, axis=0, keepdims=True)
    ez = jnp.exp(negE - m)
    logprobs = negE - m - jnp.log(jnp.sum(ez, axis=0, keepdims=True))        # [K1p, B]

    # kl_loss -= logprobs[:, c]   (select row c via one-hot; c <= Kn always)
    onehot = (krow == c).astype(f32)
    kl_ref[...] = kl_ref[...] - jnp.sum(logprobs * onehot, axis=0, keepdims=True)

    # argmax prediction (first max index) for cs_pred_train[:, n]
    mx = jnp.max(logprobs, axis=0, keepdims=True)
    cand = jnp.where(logprobs == mx, krow, K1p + 1)
    pred = jnp.min(cand, axis=0, keepdims=True).astype(f32)                  # [1, B]
    pred_ref[pl.ds(n, 1), :] = pred

    # ---- last step: entropy + single lane-dense packed output ------------------
    @pl.when(step == pl.num_programs(0) - 1)
    def _finalize():
        probs = jnp.exp(logprobs)
        ent = -jnp.sum(jnp.where(valid, probs * logprobs, 0.0),
                       axis=0, keepdims=True)                                # [1, B]
        out_ref[...] = jnp.zeros_like(out_ref)
        out_ref[0:1, 0:B] = kl_ref[...]          # row 0: kl_loss per batch
        out_ref[1:2, 0:B] = ent                  # row 1: entropy per batch
        out_ref[2:2 + N, 0:B] = pred_ref[...]    # rows 2..2+N-1: cs_pred (step-major)


# ---------------------------------------------------------------------------
# Parameter setup (deterministic, synthetic)
# ---------------------------------------------------------------------------

def init_weights(key, x_dim, H, h_dim, g_dim):
    ks = jax.random.split(key, 8)

    def lin(k, din, dout, scale=0.1):
        return jax.random.normal(k, (din, dout), jnp.float32) * scale

    return {
        "h": (lin(ks[0], x_dim, H), jnp.zeros((1, H), jnp.float32),
              lin(ks[1], H, h_dim), jnp.zeros((1, h_dim), jnp.float32)),
        "q": (lin(ks[2], x_dim, H), jnp.zeros((1, H), jnp.float32),
              lin(ks[3], H, h_dim), jnp.zeros((1, h_dim), jnp.float32)),
        "g": (lin(ks[4], h_dim, H), jnp.zeros((1, H), jnp.float32),
              lin(ks[5], H, g_dim), jnp.zeros((1, g_dim), jnp.float32)),
        # E backbone: last layer has NO bias (last_layer_bias=False)
        "E": (lin(ks[6], g_dim + h_dim, H), jnp.zeros((1, H), jnp.float32),
              lin(ks[7], H, 1)),
    }


def _block_diag(w, B):
    """B-fold block-diagonal copy of a [din, dout] weight (built host-side, once)."""
    din, dout = w.shape
    out = jnp.zeros((B * din, B * dout), w.dtype)
    for b in range(B):
        out = out.at[b * din:(b + 1) * din, b * dout:(b + 1) * dout].set(w)
    return out


# ---------------------------------------------------------------------------
# NeuralClustering.forward  (training mode: all B rows of cs identical)
# ---------------------------------------------------------------------------

def neural_clustering_forward(data, cs_row_np, weights, params):
    B, N = data.shape[0], data.shape[1]
    x_dim = int(np.prod(data.shape[2:]))
    h_dim, g_dim, H_dim = params["h_dim"], params["g_dim"], params["H_dim"]
    assert N >= 2 and B <= 128 and N <= 126, "packing bounds for the demo kernel"
    assert len(weights["E"]) == 3, "E head has no final bias"

    cs_np = np.asarray(cs_row_np, dtype=np.int32).reshape(-1)
    # K at step n = max(cs[:n]) + 1 ; Kmax over n=1..N-1 sets the padded shapes.
    K_arr = np.ones((N,), dtype=np.int32)
    for n in range(1, N):
        K_arr[n] = int(cs_np[:n].max()) + 1
    Kmax = int(K_arr[1:].max())
    R1p = _round_up(2 * Kmax + 1, 8)   # padded H rows  (sublane-aligned)
    K1p = _round_up(Kmax + 1, 8)       # padded cluster options (sublane-aligned)

    R_OUT = _round_up(2 + N, 8)
    LANES = 128

    data2 = data.reshape(B * N, x_dim).astype(jnp.float32)
    cs_vmem = jnp.asarray(cs_np).reshape(1, N)

    wh1, bh1, wh2, bh2 = weights["h"]
    wq1, bq1, wq2, bq2 = weights["q"]
    wg1, bg1, wg2, bg2 = weights["g"]
    we1, be1, we2 = weights["E"]
    we1_g = we1[:g_dim, :]             # E first layer, G half
    we1_h = we1[g_dim:, :]             # E first layer, Q half (hoisted into qW)

    # batch-on-lanes weight / bias layout (built once, outside the kernel)
    bg1_t = jnp.tile(bg1, (1, B))
    bg2_t = jnp.tile(bg2, (1, B))
    be1_t = jnp.tile(be1, (1, B))
    wg2_blk = _block_diag(wg2, B)      # [B*H, B*g]
    we1g_blk = _block_diag(we1_g, B)   # [B*g, B*H]
    we2_blk = _block_diag(we2, B)      # [B*H, B]

    vmem_inputs = [cs_vmem, data2,
                   wh1, bh1, wh2, bh2,
                   wq1, bq1, wq2, bq2,
                   wg1, we1_h,
                   bg1_t, wg2_blk, bg2_t,
                   we1g_blk, be1_t, we2_blk]

    def _const_spec(a):
        shape = tuple(a.shape)
        zero = (0,) * len(shape)
        return pl.BlockSpec(shape, lambda i, cs, ka: zero)

    grid_spec = pltpu.PrefetchScalarGridSpec(
        num_scalar_prefetch=2,                   # cs row + per-step K table (SMEM)
        grid=(N - 1,),
        in_specs=[_const_spec(a) for a in vmem_inputs],
        out_specs=pl.BlockSpec((R_OUT, LANES), lambda i, cs, ka: (0, 0)),
        scratch_shapes=[
            pltpu.VMEM((N, B * H_dim), jnp.float32),   # hW = hs @ wg1  (resident)
            pltpu.VMEM((N, B * H_dim), jnp.float32),   # qW = qs @ we1_h
            pltpu.VMEM((1, B), jnp.float32),           # kl accumulator
            pltpu.VMEM((N, B), jnp.float32),           # per-step argmax predictions
        ],
    )

    kernel = functools.partial(_fused_forward_kernel,
                               B=B, N=N, Kmax=Kmax, R1p=R1p, K1p=K1p)
    out = pl.pallas_call(
        kernel,
        out_shape=jax.ShapeDtypeStruct((R_OUT, LANES), jnp.float32),
        grid_spec=grid_spec,
        compiler_params=pltpu.CompilerParams(
            # kl/pred carried across steps and the encoders run at step 0,
            # so the step axis is a sequential ("arbitrary") axis.
            dimension_semantics=("arbitrary",)),
    )(jnp.asarray(cs_np), jnp.asarray(K_arr), *vmem_inputs)

    kl_loss = out[0, :B]
    entrpy = out[1, :B]
    cs_pred_train = out[2:2 + N, :B].T           # [B, N]

    mc_loss = jnp.zeros(())                      # TODO(synk): mc_loss_func not provided
    j_loss = jnp.ones((1,)) * -1.0               # default when 'J' not in loss_str
    K_out = jnp.ones((1,)) * float(K_arr[N - 1]) # K at the last loop step
    return mc_loss, kl_loss, j_loss, entrpy, cs_pred_train, K_out


# ---------------------------------------------------------------------------
# Demo
# ---------------------------------------------------------------------------

if __name__ == "__main__":
    params = dict(h_dim=32, g_dim=32, H_dim=64, img_sz=4,
                  include_U=True, loss_str="MC", device="tpu")
    B, N = 2, 8
    x_dim = params["img_sz"] ** 2

    key = jax.random.PRNGKey(0)
    kd, kw = jax.random.split(key)
    data = jax.random.normal(kd, (B, N, x_dim), jnp.float32)

    # ground-truth assignments; labels appear in increasing order; same for all B rows
    cs_row = np.array([0, 0, 1, 1, 2, 0, 1, 2], dtype=np.int32)

    weights = init_weights(kw, x_dim, params["H_dim"], params["h_dim"], params["g_dim"])

    out = neural_clustering_forward(data, cs_row, weights, params)
    out = jax.block_until_ready(out)
    mc_loss, kl_loss, j_loss, entrpy, cs_pred_train, K_out = out

    assert kl_loss.shape == (B,)
    assert entrpy.shape == (B,)
    assert cs_pred_train.shape == (B, N)
    assert bool(jnp.all(jnp.isfinite(kl_loss)))
    assert bool(jnp.all(jnp.isfinite(entrpy)))
    assert bool(jnp.all(cs_pred_train >= 0)) and bool(jnp.all(cs_pred_train <= 3))
    print("KERNEL_OK")
</pallas_src>

<mosaic_0001>
module attributes {stable_mosaic.version = 11 : i64} {
  func.func @_fused_forward_kernel(%arg0: i32, %arg1: memref<8xi32, #tpu.memory_space<smem>>, %arg2: memref<8xi32, #tpu.memory_space<smem>>, %arg3: memref<1x8xi32, #tpu.memory_space<vmem>>, %arg4: memref<16x16xf32, #tpu.memory_space<vmem>>, %arg5: memref<16x64xf32, #tpu.memory_space<vmem>>, %arg6: memref<1x64xf32, #tpu.memory_space<vmem>>, %arg7: memref<64x32xf32, #tpu.memory_space<vmem>>, %arg8: memref<1x32xf32, #tpu.memory_space<vmem>>, %arg9: memref<16x64xf32, #tpu.memory_space<vmem>>, %arg10: memref<1x64xf32, #tpu.memory_space<vmem>>, %arg11: memref<64x32xf32, #tpu.memory_space<vmem>>, %arg12: memref<1x32xf32, #tpu.memory_space<vmem>>, %arg13: memref<32x64xf32, #tpu.memory_space<vmem>>, %arg14: memref<32x64xf32, #tpu.memory_space<vmem>>, %arg15: memref<1x128xf32, #tpu.memory_space<vmem>>, %arg16: memref<128x64xf32, #tpu.memory_space<vmem>>, %arg17: memref<1x64xf32, #tpu.memory_space<vmem>>, %arg18: memref<64x128xf32, #tpu.memory_space<vmem>>, %arg19: memref<1x128xf32, #tpu.memory_space<vmem>>, %arg20: memref<128x2xf32, #tpu.memory_space<vmem>>, %arg21: memref<16x128xf32, #tpu.memory_space<vmem>>, %arg22: memref<8x128xf32, #tpu.memory_space<vmem>>, %arg23: memref<8x128xf32, #tpu.memory_space<vmem>>, %arg24: memref<1x2xf32, #tpu.memory_space<vmem>>, %arg25: memref<8x2xf32, #tpu.memory_space<vmem>>) attributes {dimension_semantics = [#tpu.dimension_semantics<arbitrary>], iteration_bounds = array<i64: 7>, scalar_prefetch = 2 : i64, scratch_operands = 4 : i64, tpu.core_type = #tpu.core_type<tc>, window_params = [{pipeline_mode = #tpu.pipeline_mode<synchronous>, transform_indices = @transform_0, window_bounds = array<i64: 1, 8>}, {pipeline_mode = #tpu.pipeline_mode<synchronous>, transform_indices = @transform_1, window_bounds = array<i64: 16, 16>}, {pipeline_mode = #tpu.pipeline_mode<synchronous>, transform_indices = @transform_2, window_bounds = array<i64: 16, 64>}, {pipeline_mode = #tpu.pipeline_mode<synchronous>, transform_indices = @transform_3, window_bounds = array<i64: 1, 64>}, {pipeline_mode = #tpu.pipeline_mode<synchronous>, transform_indices = @transform_4, window_bounds = array<i64: 64, 32>}, {pipeline_mode = #tpu.pipeline_mode<synchronous>, transform_indices = @transform_5, window_bounds = array<i64: 1, 32>}, {pipeline_mode = #tpu.pipeline_mode<synchronous>, transform_indices = @transform_6, window_bounds = array<i64: 16, 64>}, {pipeline_mode = #tpu.pipeline_mode<synchronous>, transform_indices = @transform_7, window_bounds = array<i64: 1, 64>}, {pipeline_mode = #tpu.pipeline_mode<synchronous>, transform_indices = @transform_8, window_bounds = array<i64: 64, 32>}, {pipeline_mode = #tpu.pipeline_mode<synchronous>, transform_indices = @transform_9, window_bounds = array<i64: 1, 32>}, {pipeline_mode = #tpu.pipeline_mode<synchronous>, transform_indices = @transform_10, window_bounds = array<i64: 32, 64>}, {pipeline_mode = #tpu.pipeline_mode<synchronous>, transform_indices = @transform_11, window_bounds = array<i64: 32, 64>}, {pipeline_mode = #tpu.pipeline_mode<synchronous>, transform_indices = @transform_12, window_bounds = array<i64: 1, 128>}, {pipeline_mode = #tpu.pipeline_mode<synchronous>, transform_indices = @transform_13, window_bounds = array<i64: 128, 64>}, {pipeline_mode = #tpu.pipeline_mode<synchronous>, transform_indices = @transform_14, window_bounds = array<i64: 1, 64>}, {pipeline_mode = #tpu.pipeline_mode<synchronous>, transform_indices = @transform_15, window_bounds = array<i64: 64, 128>}, {pipeline_mode = #tpu.pipeline_mode<synchronous>, transform_indices = @transform_16, window_bounds = array<i64: 1, 128>}, {pipeline_mode = #tpu.pipeline_mode<synchronous>, transform_indices = @transform_17, window_bounds = array<i64: 128, 2>}, {pipeline_mode = #tpu.pipeline_mode<synchronous>, transform_indices = @transform_18, window_bounds = array<i64: 16, 128>}]} {
    %c1_i32 = arith.constant 1 : i32
    %0 = arith.addi %arg0, %c1_i32 : i32
    %1 = arith.index_cast %0 : i32 to index
    %2 = memref.load %arg2[%1] : memref<8xi32, #tpu.memory_space<smem>>
    %3 = arith.index_cast %0 : i32 to index
    %4 = memref.load %arg1[%3] : memref<8xi32, #tpu.memory_space<smem>>
    %c0_i32 = arith.constant 0 : i32
    %5 = arith.cmpi eq, %arg0, %c0_i32 : i32
    %6 = arith.extui %5 : i1 to i32
    %c0_i32_0 = arith.constant 0 : i32
    %7 = arith.cmpi ne, %6, %c0_i32_0 : i32
    scf.if %7 {
      %c0_42 = arith.constant 0 : index
      %c0_43 = arith.constant 0 : index
      %136 = vector.load %arg4[%c0_42, %c0_43] : memref<16x16xf32, #tpu.memory_space<vmem>>, vector<16x16xf32>
      %c0_44 = arith.constant 0 : index
      %c0_45 = arith.constant 0 : index
      %137 = vector.load %arg5[%c0_44, %c0_45] : memref<16x64xf32, #tpu.memory_space<vmem>>, vector<16x64xf32>
      %cst_46 = arith.constant dense<0.000000e+00> : vector<16x64xf32>
      %138 = tpu.matmul %136, %137, %cst_46 {dimension_numbers = #tpu.dot_dimension_numbers<[1], [0], [0], [1], [0, 0, 1, 1], [], []>} : vector<16x16xf32>, vector<16x64xf32>, vector<16x64xf32> -> vector<16x64xf32>
      %c0_47 = arith.constant 0 : index
      %c0_48 = arith.constant 0 : index
      %139 = vector.load %arg6[%c0_47, %c0_48] : memref<1x64xf32, #tpu.memory_space<vmem>>, vector<1x64xf32>
      %140 = vector.broadcast %139 : vector<1x64xf32> to vector<16x64xf32>
      %141 = arith.addf %138, %140 : vector<16x64xf32>
      %cst_49 = arith.constant 0.000000e+00 : f32
      %142 = vector.broadcast %cst_49 : f32 to vector<16x64xf32>
      %143 = arith.maximumf %141, %142 : vector<16x64xf32>
      %c0_50 = arith.constant 0 : index
      %c0_51 = arith.constant 0 : index
      %144 = vector.load %arg7[%c0_50, %c0_51] : memref<64x32xf32, #tpu.memory_space<vmem>>, vector<64x32xf32>
      %cst_52 = arith.constant dense<0.000000e+00> : vector<16x32xf32>
      %145 = tpu.matmul %143, %144, %cst_52 {dimension_numbers = #tpu.dot_dimension_numbers<[1], [0], [0], [1], [0, 0, 1, 1], [], []>} : vector<16x64xf32>, vector<64x32xf32>, vector<16x32xf32> -> vector<16x32xf32>
      %c0_53 = arith.constant 0 : index
      %c0_54 = arith.constant 0 : index
      %146 = vector.load %arg8[%c0_53, %c0_54] : memref<1x32xf32, #tpu.memory_space<vmem>>, vector<1x32xf32>
      %147 = vector.broadcast %146 : vector<1x32xf32> to vector<16x32xf32>
      %148 = arith.addf %145, %147 : vector<16x32xf32>
      %c0_55 = arith.constant 0 : index
      %c0_56 = arith.constant 0 : index
      %149 = vector.load %arg9[%c0_55, %c0_56] : memref<16x64xf32, #tpu.memory_space<vmem>>, vector<16x64xf32>
      %cst_57 = arith.constant dense<0.000000e+00> : vector<16x64xf32>
      %150 = tpu.matmul %136, %149, %cst_57 {dimension_numbers = #tpu.dot_dimension_numbers<[1], [0], [0], [1], [0, 0, 1, 1], [], []>} : vector<16x16xf32>, vector<16x64xf32>, vector<16x64xf32> -> vector<16x64xf32>
      %c0_58 = arith.constant 0 : index
      %c0_59 = arith.constant 0 : index
      %151 = vector.load %arg10[%c0_58, %c0_59] : memref<1x64xf32, #tpu.memory_space<vmem>>, vector<1x64xf32>
      %152 = vector.broadcast %151 : vector<1x64xf32> to vector<16x64xf32>
      %153 = arith.addf %150, %152 : vector<16x64xf32>
      %cst_60 = arith.constant 0.000000e+00 : f32
      %154 = vector.broadcast %cst_60 : f32 to vector<16x64xf32>
      %155 = arith.maximumf %153, %154 : vector<16x64xf32>
      %c0_61 = arith.constant 0 : index
      %c0_62 = arith.constant 0 : index
      %156 = vector.load %arg11[%c0_61, %c0_62] : memref<64x32xf32, #tpu.memory_space<vmem>>, vector<64x32xf32>
      %cst_63 = arith.constant dense<0.000000e+00> : vector<16x32xf32>
      %157 = tpu.matmul %155, %156, %cst_63 {dimension_numbers = #tpu.dot_dimension_numbers<[1], [0], [0], [1], [0, 0, 1, 1], [], []>} : vector<16x64xf32>, vector<64x32xf32>, vector<16x32xf32> -> vector<16x32xf32>
      %c0_64 = arith.constant 0 : index
      %c0_65 = arith.constant 0 : index
      %158 = vector.load %arg12[%c0_64, %c0_65] : memref<1x32xf32, #tpu.memory_space<vmem>>, vector<1x32xf32>
      %159 = vector.broadcast %158 : vector<1x32xf32> to vector<16x32xf32>
      %160 = arith.addf %157, %159 : vector<16x32xf32>
      %161 = vector.extract_strided_slice %148 {offsets = [0, 0], sizes = [8, 32], strides = [1, 1]} : vector<16x32xf32> to vector<8x32xf32>
      %c0_66 = arith.constant 0 : index
      %c0_67 = arith.constant 0 : index
      %162 = vector.load %arg13[%c0_66, %c0_67] : memref<32x64xf32, #tpu.memory_space<vmem>>, vector<32x64xf32>
      %cst_68 = arith.constant dense<0.000000e+00> : vector<8x64xf32>
      %163 = tpu.matmul %161, %162, %cst_68 {dimension_numbers = #tpu.dot_dimension_numbers<[1], [0], [0], [1], [0, 0, 1, 1], [], []>} : vector<8x32xf32>, vector<32x64xf32>, vector<8x64xf32> -> vector<8x64xf32>
      %164 = vector.extract_strided_slice %148 {offsets = [8, 0], sizes = [8, 32], strides = [1, 1]} : vector<16x32xf32> to vector<8x32xf32>
      %c0_69 = arith.constant 0 : index
      %c0_70 = arith.constant 0 : index
      %165 = vector.load %arg13[%c0_69, %c0_70] : memref<32x64xf32, #tpu.memory_space<vmem>>, vector<32x64xf32>
      %cst_71 = arith.constant dense<0.000000e+00> : vector<8x64xf32>
      %166 = tpu.matmul %164, %165, %cst_71 {dimension_numbers = #tpu.dot_dimension_numbers<[1], [0], [0], [1], [0, 0, 1, 1], [], []>} : vector<8x32xf32>, vector<32x64xf32>, vector<8x64xf32> -> vector<8x64xf32>
      %167 = tpu.concatenate %163, %166 in 1 : vector<8x64xf32>, vector<8x64xf32> -> vector<8x128xf32>
      %c0_72 = arith.constant 0 : index
      %c0_73 = arith.constant 0 : index
      %168 = vector.load %arg22[%c0_72, %c0_73] : memref<8x128xf32, #tpu.memory_space<vmem>>, vector<8x128xf32>
      tpu.vector_store %arg22[%c0_72, %c0_73], %167 {strides = array<i32>} : memref<8x128xf32, #tpu.memory_space<vmem>>, vector<8x128xf32>,
      %169 = vector.extract_strided_slice %160 {offsets = [0, 0], sizes = [8, 32], strides = [1, 1]} : vector<16x32xf32> to vector<8x32xf32>
      %c0_74 = arith.constant 0 : index
      %c0_75 = arith.constant 0 : index
      %170 = vector.load %arg14[%c0_74, %c0_75] : memref<32x64xf32, #tpu.memory_space<vmem>>, vector<32x64xf32>
      %cst_76 = arith.constant dense<0.000000e+00> : vector<8x64xf32>
      %171 = tpu.matmul %169, %170, %cst_76 {dimension_numbers = #tpu.dot_dimension_numbers<[1], [0], [0], [1], [0, 0, 1, 1], [], []>} : vector<8x32xf32>, vector<32x64xf32>, vector<8x64xf32> -> vector<8x64xf32>
      %172 = vector.extract_strided_slice %160 {offsets = [8, 0], sizes = [8, 32], strides = [1, 1]} : vector<16x32xf32> to vector<8x32xf32>
      %c0_77 = arith.constant 0 : index
      %c0_78 = arith.constant 0 : index
      %173 = vector.load %arg14[%c0_77, %c0_78] : memref<32x64xf32, #tpu.memory_space<vmem>>, vector<32x64xf32>
      %cst_79 = arith.constant dense<0.000000e+00> : vector<8x64xf32>
      %174 = tpu.matmul %172, %173, %cst_79 {dimension_numbers = #tpu.dot_dimension_numbers<[1], [0], [0], [1], [0, 0, 1, 1], [], []>} : vector<8x32xf32>, vector<32x64xf32>, vector<8x64xf32> -> vector<8x64xf32>
      %175 = tpu.concatenate %171, %174 in 1 : vector<8x64xf32>, vector<8x64xf32> -> vector<8x128xf32>
      %c0_80 = arith.constant 0 : index
      %c0_81 = arith.constant 0 : index
      %176 = vector.load %arg23[%c0_80, %c0_81] : memref<8x128xf32, #tpu.memory_space<vmem>>, vector<8x128xf32>
      tpu.vector_store %arg23[%c0_80, %c0_81], %175 {strides = array<i32>} : memref<8x128xf32, #tpu.memory_space<vmem>>, vector<8x128xf32>,
      %cst_82 = arith.constant 0.000000e+00 : f32
      %177 = vector.broadcast %cst_82 : f32 to vector<1x2xf32>
      %c0_83 = arith.constant 0 : index
      %c0_84 = arith.constant 0 : index
      %178 = vector.load %arg24[%c0_83, %c0_84] : memref<1x2xf32, #tpu.memory_space<vmem>>, vector<1x2xf32>
      tpu.vector_store %arg24[%c0_83, %c0_84], %177 {strides = array<i32>} : memref<1x2xf32, #tpu.memory_space<vmem>>, vector<1x2xf32>,
      %cst_85 = arith.constant 0.000000e+00 : f32
      %179 = vector.broadcast %cst_85 : f32 to vector<8x2xf32>
      %c0_86 = arith.constant 0 : index
      %c0_87 = arith.constant 0 : index
      %180 = vector.load %arg25[%c0_86, %c0_87] : memref<8x2xf32, #tpu.memory_space<vmem>>, vector<8x2xf32>
      tpu.vector_store %arg25[%c0_86, %c0_87], %179 {strides = array<i32>} : memref<8x2xf32, #tpu.memory_space<vmem>>, vector<8x2xf32>,
    } else {
    }
    %8 = tpu.iota {dimensions = array<i32: 1>} : vector<8x8xi32>
    %9 = tpu.iota {dimensions = array<i32: 0>} : vector<8x8xi32>
    %c0 = arith.constant 0 : index
    %c0_1 = arith.constant 0 : index
    %10 = vector.load %arg3[%c0, %c0_1] : memref<1x8xi32, #tpu.memory_space<vmem>>, vector<1x8xi32>
    %11 = vector.shape_cast %10 : vector<1x8xi32> to vector<1x8xi32>
    %12 = vector.broadcast %11 : vector<1x8xi32> to vector<8x8xi32>
    %13 = vector.broadcast %0 : i32 to vector<8x8xi32>
    %14 = arith.cmpi slt, %8, %13 : vector<8x8xi32>
    %c-1_i32 = arith.constant -1 : i32
    %15 = vector.broadcast %c-1_i32 : i32 to vector<8x8xi32>
    %16 = arith.select %14, %12, %15 : vector<8x8xi1>, vector<8x8xi32>
    %c3_i32 = arith.constant 3 : i32
    %17 = vector.broadcast %c3_i32 : i32 to vector<8x8xi32>
    %18 = arith.cmpi slt, %9, %17 : vector<8x8xi32>
    %c3_i32_2 = arith.constant 3 : i32
    %19 = vector.broadcast %c3_i32_2 : i32 to vector<8x8xi32>
    %20 = arith.subi %9, %19 : vector<8x8xi32>
    %21 = arith.select %18, %9, %20 : vector<8x8xi1>, vector<8x8xi32>
    %22 = arith.cmpi eq, %16, %21 : vector<8x8xi32>
    %c3_i32_3 = arith.constant 3 : i32
    %23 = vector.broadcast %c3_i32_3 : i32 to vector<8x8xi32>
    %24 = arith.cmpi sge, %9, %23 : vector<8x8xi32>
    %25 = vector.broadcast %0 : i32 to vector<8x8xi32>
    %26 = arith.cmpi eq, %8, %25 : vector<8x8xi32>
    %27 = arith.andi %24, %26 : vector<8x8xi1>
    %28 = arith.ori %22, %27 : vector<8x8xi1>
    %29 = arith.extui %28 : vector<8x8xi1> to vector<8x8xi32>
    %30 = arith.sitofp %29 : vector<8x8xi32> to vector<8x8xf32>
    %31 = tpu.iota {dimensions = array<i32: 0>} : vector<8x8xi32>
    %32 = tpu.iota {dimensions = array<i32: 1>} : vector<8x8xi32>
    %33 = vector.broadcast %2 : i32 to vector<8x8xi32>
    %34 = arith.cmpi slt, %31, %33 : vector<8x8xi32>
    %35 = vector.broadcast %2 : i32 to vector<8x8xi32>
    %36 = arith.cmpi slt, %32, %35 : vector<8x8xi32>
    %37 = arith.andi %34, %36 : vector<8x8xi1>
    %38 = arith.cmpi ne, %32, %31 : vector<8x8xi32>
    %39 = arith.andi %37, %38 : vector<8x8xi1>
    %40 = vector.broadcast %2 : i32 to vector<8x8xi32>
    %41 = arith.cmpi slt, %31, %40 : vector<8x8xi32>
    %c3_i32_4 = arith.constant 3 : i32
    %42 = vector.broadcast %c3_i32_4 : i32 to vector<8x8xi32>
    %43 = arith.addi %31, %42 : vector<8x8xi32>
    %44 = arith.cmpi eq, %32, %43 : vector<8x8xi32>
    %45 = arith.andi %41, %44 : vector<8x8xi1>
    %46 = arith.ori %39, %45 : vector<8x8xi1>
    %47 = vector.broadcast %2 : i32 to vector<8x8xi32>
    %48 = arith.cmpi eq, %31, %47 : vector<8x8xi32>
    %49 = vector.broadcast %2 : i32 to vector<8x8xi32>
    %50 = arith.cmpi slt, %32, %49 : vector<8x8xi32>
    %51 = arith.andi %48, %50 : vector<8x8xi1>
    %52 = arith.ori %46, %51 : vector<8x8xi1>
    %53 = vector.broadcast %2 : i32 to vector<8x8xi32>
    %54 = arith.cmpi eq, %31, %53 : vector<8x8xi32>
    %c6_i32 = arith.constant 6 : i32
    %55 = vector.broadcast %c6_i32 : i32 to vector<8x8xi32>
    %56 = arith.cmpi eq, %32, %55 : vector<8x8xi32>
    %57 = arith.andi %54, %56 : vector<8x8xi1>
    %58 = arith.ori %52, %57 : vector<8x8xi1>
    %59 = arith.extui %58 : vector<8x8xi1> to vector<8x8xi32>
    %60 = arith.sitofp %59 : vector<8x8xi32> to vector<8x8xf32>
    %61 = tpu.iota {dimensions = array<i32: 1>} : vector<1x8xi32>
    %62 = vector.broadcast %0 : i32 to vector<1x8xi32>
    %63 = arith.cmpi sgt, %61, %62 : vector<1x8xi32>
    %64 = arith.extui %63 : vector<1x8xi1> to vector<1x8xi32>
    %65 = arith.sitofp %64 : vector<1x8xi32> to vector<1x8xf32>
    %c0_5 = arith.constant 0 : index
    %c0_6 = arith.constant 0 : index
    %66 = vector.load %arg22[%c0_5, %c0_6] : memref<8x128xf32, #tpu.memory_space<vmem>>, vector<8x128xf32>
    %cst = arith.constant dense<0.000000e+00> : vector<8x128xf32>
    %67 = tpu.matmul %30, %66, %cst {dimension_numbers = #tpu.dot_dimension_numbers<[1], [0], [0], [1], [0, 0, 1, 1], [], []>} : vector<8x8xf32>, vector<8x128xf32>, vector<8x128xf32> -> vector<8x128xf32>
    %c0_7 = arith.constant 0 : index
    %c0_8 = arith.constant 0 : index
    %68 = vector.load %arg15[%c0_7, %c0_8] : memref<1x128xf32, #tpu.memory_space<vmem>>, vector<1x128xf32>
    %69 = vector.broadcast %68 : vector<1x128xf32> to vector<8x128xf32>
    %70 = arith.addf %67, %69 : vector<8x128xf32>
    %cst_9 = arith.constant 0.000000e+00 : f32
    %71 = vector.broadcast %cst_9 : f32 to vector<8x128xf32>
    %72 = arith.maximumf %70, %71 : vector<8x128xf32>
    %c0_10 = arith.constant 0 : index
    %c0_11 = arith.constant 0 : index
    %73 = vector.load %arg16[%c0_10, %c0_11] : memref<128x64xf32, #tpu.memory_space<vmem>>, vector<128x64xf32>
    %cst_12 = arith.constant dense<0.000000e+00> : vector<8x64xf32>
    %74 = tpu.matmul %72, %73, %cst_12 {dimension_numbers = #tpu.dot_dimension_numbers<[1], [0], [0], [1], [0, 0, 1, 1], [], []>} : vector<8x128xf32>, vector<128x64xf32>, vector<8x64xf32> -> vector<8x64xf32>
    %c0_13 = arith.constant 0 : index
    %c0_14 = arith.constant 0 : index
    %75 = vector.load %arg17[%c0_13, %c0_14] : memref<1x64xf32, #tpu.memory_space<vmem>>, vector<1x64xf32>
    %76 = vector.broadcast %75 : vector<1x64xf32> to vector<8x64xf32>
    %77 = arith.addf %74, %76 : vector<8x64xf32>
    %cst_15 = arith.constant dense<0.000000e+00> : vector<8x64xf32>
    %78 = tpu.matmul %60, %77, %cst_15 {dimension_numbers = #tpu.dot_dimension_numbers<[1], [0], [0], [1], [0, 0, 1, 1], [], []>} : vector<8x8xf32>, vector<8x64xf32>, vector<8x64xf32> -> vector<8x64xf32>
    %c0_16 = arith.constant 0 : index
    %c0_17 = arith.constant 0 : index
    %79 = vector.load %arg23[%c0_16, %c0_17] : memref<8x128xf32, #tpu.memory_space<vmem>>, vector<8x128xf32>
    %cst_18 = arith.constant dense<0.000000e+00> : vector<1x128xf32>
    %80 = tpu.matmul %65, %79, %cst_18 {dimension_numbers = #tpu.dot_dimension_numbers<[1], [0], [0], [1], [0, 0, 1, 1], [], []>} : vector<1x8xf32>, vector<8x128xf32>, vector<1x128xf32> -> vector<1x128xf32>
    %c0_19 = arith.constant 0 : index
    %c0_20 = arith.constant 0 : index
    %81 = vector.load %arg18[%c0_19, %c0_20] : memref<64x128xf32, #tpu.memory_space<vmem>>, vector<64x128xf32>
    %cst_21 = arith.constant dense<0.000000e+00> : vector<8x128xf32>
    %82 = tpu.matmul %78, %81, %cst_21 {dimension_numbers = #tpu.dot_dimension_numbers<[1], [0], [0], [1], [0, 0, 1, 1], [], []>} : vector<8x64xf32>, vector<64x128xf32>, vector<8x128xf32> -> vector<8x128xf32>
    %83 = vector.shape_cast %80 : vector<1x128xf32> to vector<1x128xf32>
    %84 = vector.broadcast %83 : vector<1x128xf32> to vector<8x128xf32>
    %85 = arith.addf %82, %84 : vector<8x128xf32>
    %c0_22 = arith.constant 0 : index
    %c0_23 = arith.constant 0 : index
    %86 = vector.load %arg19[%c0_22, %c0_23] : memref<1x128xf32, #tpu.memory_space<vmem>>, vector<1x128xf32>
    %87 = vector.broadcast %86 : vector<1x128xf32> to vector<8x128xf32>
    %88 = arith.addf %85, %87 : vector<8x128xf32>
    %cst_24 = arith.constant 0.000000e+00 : f32
    %89 = vector.broadcast %cst_24 : f32 to vector<8x128xf32>
    %90 = arith.maximumf %88, %89 : vector<8x128xf32>
    %c0_25 = arith.constant 0 : index
    %c0_26 = arith.constant 0 : index
    %91 = vector.load %arg20[%c0_25, %c0_26] : memref<128x2xf32, #tpu.memory_space<vmem>>, vector<128x2xf32>
    %cst_27 = arith.constant dense<0.000000e+00> : vector<8x2xf32>
    %92 = tpu.matmul %90, %91, %cst_27 {dimension_numbers = #tpu.dot_dimension_numbers<[1], [0], [0], [1], [0, 0, 1, 1], [], []>} : vector<8x128xf32>, vector<128x2xf32>, vector<8x2xf32> -> vector<8x2xf32>
    %93 = tpu.iota {dimensions = array<i32: 0>} : vector<8x2xi32>
    %94 = vector.broadcast %2 : i32 to vector<8x2xi32>
    %95 = arith.cmpi sle, %93, %94 : vector<8x2xi32>
    %cst_28 = arith.constant 0.000000e+00 : f32
    %96 = vector.broadcast %cst_28 : f32 to vector<8x2xf32>
    %97 = arith.subf %96, %92 : vector<8x2xf32>
    %cst_29 = arith.constant -1.000000e+30 : f32
    %98 = vector.broadcast %cst_29 : f32 to vector<8x2xf32>
    %99 = arith.select %95, %97, %98 : vector<8x2xi1>, vector<8x2xf32>
    %cst_30 = arith.constant dense<0xFF800000> : vector<2xf32>
    %100 = vector.multi_reduction <maximumf>, %99, %cst_30 [0] : vector<8x2xf32> to vector<2xf32>
    %101 = vector.shape_cast %100 : vector<2xf32> to vector<1x2xf32>
    %102 = vector.broadcast %101 : vector<1x2xf32> to vector<8x2xf32>
    %103 = arith.subf %99, %102 : vector<8x2xf32>
    %104 = math.exp %103 : vector<8x2xf32>
    %105 = vector.broadcast %101 : vector<1x2xf32> to vector<8x2xf32>
    %106 = arith.subf %99, %105 : vector<8x2xf32>
    %cst_31 = arith.constant dense<0.000000e+00> : vector<2xf32>
    %107 = vector.multi_reduction <add>, %104, %cst_31 [0] : vector<8x2xf32> to vector<2xf32>
    %108 = vector.shape_cast %107 : vector<2xf32> to vector<1x2xf32>
    %109 = math.log %108 : vector<1x2xf32>
    %110 = vector.broadcast %109 : vector<1x2xf32> to vector<8x2xf32>
    %111 = arith.subf %106, %110 : vector<8x2xf32>
    %112 = vector.broadcast %4 : i32 to vector<8x2xi32>
    %113 = arith.cmpi eq, %93, %112 : vector<8x2xi32>
    %114 = arith.extui %113 : vector<8x2xi1> to vector<8x2xi32>
    %115 = arith.sitofp %114 : vector<8x2xi32> to vector<8x2xf32>
    %c0_32 = arith.constant 0 : index
    %c0_33 = arith.constant 0 : index
    %116 = vector.load %arg24[%c0_32, %c0_33] : memref<1x2xf32, #tpu.memory_space<vmem>>, vector<1x2xf32>
    %117 = arith.mulf %111, %115 : vector<8x2xf32>
    %cst_34 = arith.constant dense<0.000000e+00> : vector<2xf32>
    %118 = vector.multi_reduction <add>, %117, %cst_34 [0] : vector<8x2xf32> to vector<2xf32>
    %119 = vector.shape_cast %118 : vector<2xf32> to vector<1x2xf32>
    %120 = arith.subf %116, %119 : vector<1x2xf32>
    %c0_35 = arith.constant 0 : index
    %c0_36 = arith.constant 0 : index
    %121 = vector.load %arg24[%c0_35, %c0_36] : memref<1x2xf32, #tpu.memory_space<vmem>>, vector<1x2xf32>
    tpu.vector_store %arg24[%c0_35, %c0_36], %120 {strides = array<i32>} : memref<1x2xf32, #tpu.memory_space<vmem>>, vector<1x2xf32>,
    %cst_37 = arith.constant dense<0xFF800000> : vector<2xf32>
    %122 = vector.multi_reduction <maximumf>, %111, %cst_37 [0] : vector<8x2xf32> to vector<2xf32>
    %123 = vector.shape_cast %122 : vector<2xf32> to vector<1x2xf32>
    %124 = vector.broadcast %123 : vector<1x2xf32> to vector<8x2xf32>
    %125 = arith.cmpf oeq, %111, %124 : vector<8x2xf32>
    %c9_i32 = arith.constant 9 : i32
    %126 = vector.broadcast %c9_i32 : i32 to vector<8x2xi32>
    %127 = arith.select %125, %93, %126 : vector<8x2xi1>, vector<8x2xi32>
    %cst_38 = arith.constant dense<2147483647> : vector<2xi32>
    %128 = vector.multi_reduction <minsi>, %127, %cst_38 [0] : vector<8x2xi32> to vector<2xi32>
    %129 = vector.shape_cast %128 : vector<2xi32> to vector<1x2xi32>
    %130 = arith.sitofp %129 : vector<1x2xi32> to vector<1x2xf32>
    %131 = arith.index_cast %0 : i32 to index
    %c0_39 = arith.constant 0 : index
    %132 = vector.load %arg25[%131, %c0_39] : memref<8x2xf32, #tpu.memory_space<vmem>>, vector<1x2xf32>
    tpu.vector_store %arg25[%131, %c0_39], %130 {strides = array<i32>} : memref<8x2xf32, #tpu.memory_space<vmem>>, vector<1x2xf32>,
    %c6_i32_40 = arith.constant 6 : i32
    %133 = arith.cmpi eq, %arg0, %c6_i32_40 : i32
    %134 = arith.extui %133 : i1 to i32
    %c0_i32_41 = arith.constant 0 : i32
    %135 = arith.cmpi ne, %134, %c0_i32_41 : i32
    scf.if %135 {
      %136 = math.exp %111 : vector<8x2xf32>
      %137 = arith.mulf %136, %111 : vector<8x2xf32>
      %cst_42 = arith.constant 0.000000e+00 : f32
      %138 = vector.broadcast %cst_42 : f32 to vector<8x2xf32>
      %139 = arith.select %95, %137, %138 : vector<8x2xi1>, vector<8x2xf32>
      %cst_43 = arith.constant dense<0.000000e+00> : vector<2xf32>
      %140 = vector.multi_reduction <add>, %139, %cst_43 [0] : vector<8x2xf32> to vector<2xf32>
      %141 = vector.shape_cast %140 : vector<2xf32> to vector<1x2xf32>
      %cst_44 = arith.constant 0.000000e+00 : f32
      %142 = vector.broadcast %cst_44 : f32 to vector<1x2xf32>
      %143 = arith.subf %142, %141 : vector<1x2xf32>
      %cst_45 = arith.constant 0.000000e+00 : f32
      %144 = vector.broadcast %cst_45 : f32 to vector<16x128xf32>
      %c0_46 = arith.constant 0 : index
      %c0_47 = arith.constant 0 : index
      %145 = vector.load %arg21[%c0_46, %c0_47] : memref<16x128xf32, #tpu.memory_space<vmem>>, vector<16x128xf32>
      tpu.vector_store %arg21[%c0_46, %c0_47], %144 {strides = array<i32>} : memref<16x128xf32, #tpu.memory_space<vmem>>, vector<16x128xf32>,
      %c0_48 = arith.constant 0 : index
      %c0_49 = arith.constant 0 : index
      %146 = vector.load %arg24[%c0_48, %c0_49] : memref<1x2xf32, #tpu.memory_space<vmem>>, vector<1x2xf32>
      %c0_50 = arith.constant 0 : index
      %c0_51 = arith.constant 0 : index
      %147 = vector.load %arg21[%c0_50, %c0_51] : memref<16x128xf32, #tpu.memory_space<vmem>>, vector<1x2xf32>
      tpu.vector_store %arg21[%c0_50, %c0_51], %146 {strides = array<i32>} : memref<16x128xf32, #tpu.memory_space<vmem>>, vector<1x2xf32>,
      %c1 = arith.constant 1 : index
      %c0_52 = arith.constant 0 : index
      %148 = vector.load %arg21[%c1, %c0_52] : memref<16x128xf32, #tpu.memory_space<vmem>>, vector<1x2xf32>
      tpu.vector_store %arg21[%c1, %c0_52], %143 {strides = array<i32>} : memref<16x128xf32, #tpu.memory_space<vmem>>, vector<1x2xf32>,
      %c0_53 = arith.constant 0 : index
      %c0_54 = arith.constant 0 : index
      %149 = vector.load %arg25[%c0_53, %c0_54] : memref<8x2xf32, #tpu.memory_space<vmem>>, vector<8x2xf32>
      %c2 = arith.constant 2 : index
      %c0_55 = arith.constant 0 : index
      %150 = vector.load %arg21[%c2, %c0_55] : memref<16x128xf32, #tpu.memory_space<vmem>>, vector<8x2xf32>
      tpu.vector_store %arg21[%c2, %c0_55], %149 {strides = array<i32>} : memref<16x128xf32, #tpu.memory_space<vmem>>, vector<8x2xf32>,
    } else {
    }
    return
  }
  func.func @transform_0(%arg0: i32, %arg1: memref<8xi32, #tpu.memory_space<smem>>, %arg2: memref<8xi32, #tpu.memory_space<smem>>) -> (i32, i32) {
    %c0_i32 = arith.constant 0 : i32
    %c0_i32_0 = arith.constant 0 : i32
    %c0_i32_1 = arith.constant 0 : i32
    return %c0_i32, %c0_i32_0 : i32, i32
  }
  func.func @transform_1(%arg0: i32, %arg1: memref<8xi32, #tpu.memory_space<smem>>, %arg2: memref<8xi32, #tpu.memory_space<smem>>) -> (i32, i32) {
    %c0_i32 = arith.constant 0 : i32
    %c0_i32_0 = arith.constant 0 : i32
    %c0_i32_1 = arith.constant 0 : i32
    return %c0_i32, %c0_i32_0 : i32, i32
  }
  func.func @transform_2(%arg0: i32, %arg1: memref<8xi32, #tpu.memory_space<smem>>, %arg2: memref<8xi32, #tpu.memory_space<smem>>) -> (i32, i32) {
    %c0_i32 = arith.constant 0 : i32
    %c0_i32_0 = arith.constant 0 : i32
    %c0_i32_1 = arith.constant 0 : i32
    return %c0_i32, %c0_i32_0 : i32, i32
  }
  func.func @transform_3(%arg0: i32, %arg1: memref<8xi32, #tpu.memory_space<smem>>, %arg2: memref<8xi32, #tpu.memory_space<smem>>) -> (i32, i32) {
    %c0_i32 = arith.constant 0 : i32
    %c0_i32_0 = arith.constant 0 : i32
    %c0_i32_1 = arith.constant 0 : i32
    return %c0_i32, %c0_i32_0 : i32, i32
  }
  func.func @transform_4(%arg0: i32, %arg1: memref<8xi32, #tpu.memory_space<smem>>, %arg2: memref<8xi32, #tpu.memory_space<smem>>) -> (i32, i32) {
    %c0_i32 = arith.constant 0 : i32
    %c0_i32_0 = arith.constant 0 : i32
    %c0_i32_1 = arith.constant 0 : i32
    return %c0_i32, %c0_i32_0 : i32, i32
  }
  func.func @transform_5(%arg0: i32, %arg1: memref<8xi32, #tpu.memory_space<smem>>, %arg2: memref<8xi32, #tpu.memory_space<smem>>) -> (i32, i32) {
    %c0_i32 = arith.constant 0 : i32
    %c0_i32_0 = arith.constant 0 : i32
    %c0_i32_1 = arith.constant 0 : i32
    return %c0_i32, %c0_i32_0 : i32, i32
  }
  func.func @transform_6(%arg0: i32, %arg1: memref<8xi32, #tpu.memory_space<smem>>, %arg2: memref<8xi32, #tpu.memory_space<smem>>) -> (i32, i32) {
    %c0_i32 = arith.constant 0 : i32
    %c0_i32_0 = arith.constant 0 : i32
    %c0_i32_1 = arith.constant 0 : i32
    return %c0_i32, %c0_i32_0 : i32, i32
  }
  func.func @transform_7(%arg0: i32, %arg1: memref<8xi32, #tpu.memory_space<smem>>, %arg2: memref<8xi32, #tpu.memory_space<smem>>) -> (i32, i32) {
    %c0_i32 = arith.constant 0 : i32
    %c0_i32_0 = arith.constant 0 : i32
    %c0_i32_1 = arith.constant 0 : i32
    return %c0_i32, %c0_i32_0 : i32, i32
  }
  func.func @transform_8(%arg0: i32, %arg1: memref<8xi32, #tpu.memory_space<smem>>, %arg2: memref<8xi32, #tpu.memory_space<smem>>) -> (i32, i32) {
    %c0_i32 = arith.constant 0 : i32
    %c0_i32_0 = arith.constant 0 : i32
    %c0_i32_1 = arith.constant 0 : i32
    return %c0_i32, %c0_i32_0 : i32, i32
  }
  func.func @transform_9(%arg0: i32, %arg1: memref<8xi32, #tpu.memory_space<smem>>, %arg2: memref<8xi32, #tpu.memory_space<smem>>) -> (i32, i32) {
    %c0_i32 = arith.constant 0 : i32
    %c0_i32_0 = arith.constant 0 : i32
    %c0_i32_1 = arith.constant 0 : i32
    return %c0_i32, %c0_i32_0 : i32, i32
  }
  func.func @transform_10(%arg0: i32, %arg1: memref<8xi32, #tpu.memory_space<smem>>, %arg2: memref<8xi32, #tpu.memory_space<smem>>) -> (i32, i32) {
    %c0_i32 = arith.constant 0 : i32
    %c0_i32_0 = arith.constant 0 : i32
    %c0_i32_1 = arith.constant 0 : i32
    return %c0_i32, %c0_i32_0 : i32, i32
  }
  func.func @transform_11(%arg0: i32, %arg1: memref<8xi32, #tpu.memory_space<smem>>, %arg2: memref<8xi32, #tpu.memory_space<smem>>) -> (i32, i32) {
    %c0_i32 = arith.constant 0 : i32
    %c0_i32_0 = arith.constant 0 : i32
    %c0_i32_1 = arith.constant 0 : i32
    return %c0_i32, %c0_i32_0 : i32, i32
  }
  func.func @transform_12(%arg0: i32, %arg1: memref<8xi32, #tpu.memory_space<smem>>, %arg2: memref<8xi32, #tpu.memory_space<smem>>) -> (i32, i32) {
    %c0_i32 = arith.constant 0 : i32
    %c0_i32_0 = arith.constant 0 : i32
    %c0_i32_1 = arith.constant 0 : i32
    return %c0_i32, %c0_i32_0 : i32, i32
  }
  func.func @transform_13(%arg0: i32, %arg1: memref<8xi32, #tpu.memory_space<smem>>, %arg2: memref<8xi32, #tpu.memory_space<smem>>) -> (i32, i32) {
    %c0_i32 = arith.constant 0 : i32
    %c0_i32_0 = arith.constant 0 : i32
    %c0_i32_1 = arith.constant 0 : i32
    return %c0_i32, %c0_i32_0 : i32, i32
  }
  func.func @transform_14(%arg0: i32, %arg1: memref<8xi32, #tpu.memory_space<smem>>, %arg2: memref<8xi32, #tpu.memory_space<smem>>) -> (i32, i32) {
    %c0_i32 = arith.constant 0 : i32
    %c0_i32_0 = arith.constant 0 : i32
    %c0_i32_1 = arith.constant 0 : i32
    return %c0_i32, %c0_i32_0 : i32, i32
  }
  func.func @transform_15(%arg0: i32, %arg1: memref<8xi32, #tpu.memory_space<smem>>, %arg2: memref<8xi32, #tpu.memory_space<smem>>) -> (i32, i32) {
    %c0_i32 = arith.constant 0 : i32
    %c0_i32_0 = arith.constant 0 : i32
    %c0_i32_1 = arith.constant 0 : i32
    return %c0_i32, %c0_i32_0 : i32, i32
  }
  func.func @transform_16(%arg0: i32, %arg1: memref<8xi32, #tpu.memory_space<smem>>, %arg2: memref<8xi32, #tpu.memory_space<smem>>) -> (i32, i32) {
    %c0_i32 = arith.constant 0 : i32
    %c0_i32_0 = arith.constant 0 : i32
    %c0_i32_1 = arith.constant 0 : i32
    return %c0_i32, %c0_i32_0 : i32, i32
  }
  func.func @transform_17(%arg0: i32, %arg1: memref<8xi32, #tpu.memory_space<smem>>, %arg2: memref<8xi32, #tpu.memory_space<smem>>) -> (i32, i32) {
    %c0_i32 = arith.constant 0 : i32
    %c0_i32_0 = arith.constant 0 : i32
    %c0_i32_1 = arith.constant 0 : i32
    return %c0_i32, %c0_i32_0 : i32, i32
  }
  func.func @transform_18(%arg0: i32, %arg1: memref<8xi32, #tpu.memory_space<smem>>, %arg2: memref<8xi32, #tpu.memory_space<smem>>) -> (i32, i32) {
    %c0_i32 = arith.constant 0 : i32
    %c0_i32_0 = arith.constant 0 : i32
    %c0_i32_1 = arith.constant 0 : i32
    return %c0_i32, %c0_i32_0 : i32, i32
  }
}

</mosaic_0001>

<bundles_post_ra>
// kernel: tpu_custom_call.1
= control target key start
LH: loop header
LB: loop body
LE: loop exit
PB: predicated region body
PF: predicated region fallthrough
CT: control target
= control target key end

     0   :  { %s2905_s0 = inlined_call_operand.vmem [shape: s32[8], index: 0, kind: input, shape index: {}]   ;;  %s2906_s2 = inlined_call_operand.vmem [shape: s32[1,8], index: 2, kind: input, shape index: {}]   ;;  %s2907_s3 = inlined_call_operand.vmem [shape: f32[16,16], index: 3, kind: input, shape index: {}]   ;;  %s2908_s4 = inlined_call_operand.vmem [shape: f32[16,64], index: 4, kind: input, shape index: {}]   ;;  %s2909_s5 = inlined_call_operand.vmem [shape: f32[1,64], index: 5, kind: input, shape index: {}]   ;;  %s2910_s6 = inlined_call_operand.vmem [shape: f32[64,32], index: 6, kind: input, shape index: {}]   ;;  %s2911_s7 = inlined_call_operand.vmem [shape: f32[1,32], index: 7, kind: input, shape index: {}]   ;;  %s2912_s8 = inlined_call_operand.vmem [shape: f32[16,64], index: 8, kind: input, shape index: {}]   ;;  %s2913_s9 = inlined_call_operand.vmem [shape: f32[1,64], index: 9, kind: input, shape index: {}]   ;;  %s2914_s10 = inlined_call_operand.vmem [shape: f32[64,32], index: 10, kind: input, shape index: {}]   ;;  %s2915_s11 = inlined_call_operand.vmem [shape: f32[1,32], index: 11, kind: input, shape index: {}]   ;;  %s2916_s12 = inlined_call_operand.vmem [shape: f32[32,64], index: 12, kind: input, shape index: {}]   ;;  %s2917_s13 = inlined_call_operand.vmem [shape: f32[32,64], index: 13, kind: input, shape index: {}]   ;;  %s2918_s14 = inlined_call_operand.vmem [shape: f32[1,128], index: 14, kind: input, shape index: {}]   ;;  %s2919_s15 = inlined_call_operand.vmem [shape: f32[128,64], index: 15, kind: input, shape index: {}]   ;;  %s2920_s16 = inlined_call_operand.vmem [shape: f32[1,64], index: 16, kind: input, shape index: {}]   ;;  %s2921_s17 = inlined_call_operand.vmem [shape: f32[64,128], index: 17, kind: input, shape index: {}]   ;;  %s2922_s18 = inlined_call_operand.vmem [shape: f32[1,128], index: 18, kind: input, shape index: {}]   ;;  %s2923_s19 = inlined_call_operand.vmem [shape: f32[128,2], index: 19, kind: input, shape index: {}]   ;;  %s2924_s20 = inlined_call_operand.hbm [shape: f32[16,128], index: 20, kind: output, shape index: {}]   ;;  %s2925_s1 = inlined_call_operand.vmem [shape: s32[8], index: 1, kind: input, shape index: {}]  }
   0x1   :  { %2928 = sst [smem:[#allocation13_spill]] %s2905_s0  ;;  %s29_s25 = sshll.u32 %s2925_s1, 4  ;;  %s30_s25 = int_to_ptr.vmem [resolvable:$true] %s29_s25 }
   0x2   :  { %2929 = sst [smem:[#allocation14_spill]] %s2906_s2 }
   0x3   :  { %2930 = sst [smem:[#allocation15_spill]] %s2907_s3 }
   0x4   :  { %2931 = sst [smem:[#allocation16_spill]] %s2908_s4 }
   0x5   :  { %2932 = sst [smem:[#allocation17_spill]] %s2909_s5 }
   0x6   :  { %2933 = sst [smem:[#allocation18_spill]] %s2918_s14 }
   0x7   :  { %s2934_s23 = sld [smem:[#allocation13_spill]] }
   0xd   :  { %s25_s14 = sshll.u32 %s2934_s23, 4  ;;  %s26_s14 = int_to_ptr.vmem [resolvable:$true] %s25_s14 }
   0xe   :  { %s2294_s4 = scalar_lea.vmem %s26_s14, 16  ;;  %p2299_p1 = scmp.lt.s32.totalorder %s26_s14, %s26_s14 }
   0xf   :  { %p2295_p0 = scmp.ne.s32.totalorder %s26_s14, %s2294_s4  ;;  %p2300_p2 = scmp.lt.s32.totalorder %s2294_s4, %s2294_s4 }
  0x11   :  { %p2301_p3 = por %p2300_p2, %p2299_p1 }
  0x13   :  { %p2302_p4 = pnand %p2301_p3, %p2295_p0 }
  0x15   :  { %2305 = shalt.err (!%p2302_p4)  }
  0x16   :  { %s2356_s26 = smov [#allocation7]   ;;  %s2306_s27 = scalar_lea.vmem %s30_s25, 16 }
  0x17   :  { %28 = dma.vmem_to_smem %s26_s14, 16, %s2356_s26, [#allocation6] }
  0x18   :  { %p2307_p5 = scmp.ne.s32.totalorder %s30_s25, %s2306_s27  ;;  %p2311_p6 = scmp.lt.s32.totalorder %s30_s25, %s30_s25 }
  0x19   :  { %p2312_p7 = scmp.lt.s32.totalorder %s2306_s27, %s2306_s27 }
  0x1b   :  { %p2313_p8 = por %p2312_p7, %p2311_p6 }
  0x1d   :  { %p2314_p9 = pnand %p2313_p8, %p2307_p5 }
  0x1f   :  { %2317 = shalt.err (!%p2314_p9)  }
  0x20   :  { %s2357_s28 = smov [#allocation8]  }
  0x21   :  { %32 = dma.vmem_to_smem %s30_s25, 16, %s2357_s28, [#allocation6] }
  0x22   :  { %2346 = dma.done.wait [#allocation6], 32 }
  0x23   :  { %2347 = vsyncadd [#allocation6], 4294967264 }
  0x24   :  { %34 = sfence }
  0x25   :  { %35 = vsyncpa [#allocation10], 0  ;;  %s2478_s1 = smov 0  }
  0x26 LB: > { %s2484_s14 = sadd.s32 4294967295, %s2354_s1   ;;  %p1924_p10 = scmp.ge.s32.totalorder %s2354_s1, 1  ;;  %s2354_s1 = sphi %s2478_s1, %s41_s1  }
  0x27   : > { %p510_p11 = scmp.lt.s32.totalorder %s2354_s1, 8 }
  0x29   : > { %p511_p12 = pnand %p1924_p10, %p510_p11 }
  0x2a   : > { %s2489_s5 = sadd.s32 (!%p511_p12), 1, %s2484_s14  ;;  %p1925_p13 = scmp.ne.s32.totalorder (!%p511_p12), %s2484_s14, 0 }
  0x2b   : > { %514 = sbr.rel (%p511_p12) target bundleno = 1908 (0x774), region = 92  ;;  %s2492_s29 = sld [smem:[#allocation8 + %s2489_s5]] (!%p511_p12) }
  0x2c   : > { %s2495_s30 = sld [smem:[#allocation7 + %s2489_s5]] (!%p511_p12) }
  0x30   : > { %560 = sbr.rel (%p1925_p13) target bundleno = 772 (0x304), region = 96  ;;  %s2935_s2 = sld [smem:[#allocation16_spill]] (!%p1925_p13) }
  0x31   : > { %s2936_s26 = sld [smem:[#allocation15_spill]] (!%p1925_p13)  ;;  %s2360_s28 = smov (!%p1925_p13), 64  }
  0x32   : > { %s2937_s25 = sld [smem:[#allocation17_spill]] (!%p1925_p13) }
  0x35   : > { %v754_v2 = vld [vmem:[%s2912_s8 + $0x8] sm:$0xff]  ;;  %vm572_vm0 = vcmask 130048   ;;  %v753_v4 = vld [vmem:[%s2912_s8] sm:$0xff]  ;;  %v663_v6 = vld [vmem:[%s2910_s6 + $0x38] sm:$0xff]  ;;  %vm1248_vm1 = vcmask 8192   ;;  %vm1250_vm2 = vcmask 15360  }
  0x36   : > { %v564_v0 = vld [vmem:[%s2935_s2 + $0x8] sm:$0xff]  ;;  %v563_v1 = vld [vmem:[%s2935_s2] sm:$0xff]  ;;  %2089 = vmatprep.subr.mxu0 %v754_v2  ;;  %v662_v7 = vld [vmem:[%s2910_s6 + $0x30] sm:$0xff]  ;;  %v2358_v22 = vmov 0.0   ;;  %vm671_vm3 = vcmask 523264   ;;  %vm2359_vm4 = vmmov 0  }
  0x37   : > { %2063 = vmatprep.subr.mxu1 %v564_v0  ;;  %v561_v3 = vld [vmem:[%s2936_s26] sm:$0xff]  ;;  %v562_v5 = vld [vmem:[%s2936_s26 + $0x8] sm:$0xff]  ;;  %2090 = vmatpush3.msra.mxu0 %v754_v2  ;;  %v846_v8 = vld [vmem:[%s2914_s10 + $0x38] sm:$0xff]  ;;  %1249 = vst.msk [vmem:[#allocation4] sm:$0x1] %vm1248_vm1, %v2358_v22  ;;  %vm939_vm5 = vcmask 261120  }
  0x38   : > { %2064 = vmatpush3.msra.mxu1 %v564_v0  ;;  %2067 = vmatprep.mubr.msk.f32.mxu1 %vm572_vm0, %v561_v3  ;;  %v661_v9 = vld [vmem:[%s2910_s6 + $0x28] sm:$0xff]  ;;  %v845_v10 = vld [vmem:[%s2914_s10 + $0x30] sm:$0xff]  ;;  %v660_v11 = vld [vmem:[%s2910_s6 + $0x20] sm:$0xff]  ;;  %1251 = vst.msk [vmem:[#allocation5] sm:$0xff] %vm1250_vm2, %v2358_v22 }
  0x39   : > { %2065 = vmatprep.subr.mxu1 %v563_v1  ;;  %2091 = vmatprep.subr.mxu0 %v753_v4  ;;  %v844_v12 = vld [vmem:[%s2914_s10 + $0x28] sm:$0xff]  ;;  %v659_v13 = vld [vmem:[%s2910_s6 + $0x18] sm:$0xff]  ;;  %v843_v14 = vld [vmem:[%s2914_s10 + $0x20] sm:$0xff] }
  0x3a   : > { %2066 = vmatpush3.msra.mxu1 %v563_v1  ;;  %2092 = vmatpush3.msra.mxu0 %v753_v4  ;;  %v658_v15 = vld [vmem:[%s2910_s6 + $0x10] sm:$0xff]  ;;  %v842_v16 = vld [vmem:[%s2914_s10 + $0x18] sm:$0xff]  ;;  %v657_v17 = vld [vmem:[%s2910_s6 + $0x8] sm:$0xff] }
  0x3b   : > { %2068 = vmatmul.mubr.msk.f32.vlgmr.msra.gmra.mxu1 %vm572_vm0, %v562_v5  ;;  %2093 = vmatprep.mubr.msk.f32.mxu0 %vm572_vm0, %v561_v3  ;;  %v841_v18 = vld [vmem:[%s2914_s10 + $0x10] sm:$0xff]  ;;  %v656_v19 = vld [vmem:[%s2910_s6] sm:$0xff]  ;;  %v840_v20 = vld [vmem:[%s2914_s10 + $0x8] sm:$0xff] }
  0x3c   : > { %2070 = vmatprep.subr.mxu1 %v663_v6  ;;  %2094 = vmatmul.mubr.msk.f32.vlgmr.msra.gmra.mxu0 %vm572_vm0, %v562_v5  ;;  %v839_v21 = vld [vmem:[%s2914_s10] sm:$0xff]  ;;  %v938_v37 = vld [vmem:[%s2916_s12 + $0x18] sm:$0xff]  ;;  %v937_v38 = vld [vmem:[%s2916_s12 + $0x10] sm:$0xff] }
  0x3d   : > { %2071 = vmatpush3.msra.mxu1 %v663_v6  ;;  %2096 = vmatprep.subr.mxu0 %v846_v8  ;;  %v1926_v23 = vld [vmem:[%s2937_s25] ss:$0 sm:$0xff]  ;;  %v936_v39 = vld [vmem:[%s2916_s12 + $0x8] sm:$0xff]  ;;  %v1095_v44 = vld [vmem:[%s2917_s13 + $0x18] sm:$0xff] }
  0x3e   : > { %2072 = vmatprep.subr.mxu1 %v662_v7  ;;  %2097 = vmatpush3.msra.mxu0 %v846_v8  ;;  %v1932_v25 = vld [vmem:[%s2913_s9] ss:$0 sm:$0xff]  ;;  %v1094_v47 = vld [vmem:[%s2917_s13 + $0x10] sm:$0xff]  ;;  %v1093_v49 = vld [vmem:[%s2917_s13 + $0x8] sm:$0xff] }
  0x3f   : > { %2073 = vmatpush3.msra.mxu1 %v662_v7  ;;  %2098 = vmatprep.subr.mxu0 %v845_v10  ;;  %v935_v40 = vld [vmem:[%s2916_s12] sm:$0xff] }
  0x40   : > { %2074 = vmatprep.subr.mxu1 %v661_v9  ;;  %2099 = vmatpush3.msra.mxu0 %v845_v10  ;;  %v1929_v41 = vld [vmem:[%s2911_s7] ss:$0 sm:$0xff] }
  0x41   : > { %2075 = vmatpush3.msra.mxu1 %v661_v9  ;;  %2100 = vmatprep.subr.mxu0 %v844_v12  ;;  %v1935_v50 = vld [vmem:[%s2915_s11] ss:$0 sm:$0xff] }
  0x42   : > { %2076 = vmatprep.subr.mxu1 %v660_v11  ;;  %2101 = vmatpush3.msra.mxu0 %v844_v12  ;;  %v1092_v51 = vld [vmem:[%s2917_s13] sm:$0xff] }
  0x43   : > { %2077 = vmatpush3.msra.mxu1 %v660_v11  ;;  %2102 = vmatprep.subr.mxu0 %v843_v14 }
  0x44   : > { %2078 = vmatprep.subr.mxu1 %v659_v13  ;;  %2103 = vmatpush3.msra.mxu0 %v843_v14 }
  0x45   : > { %2079 = vmatpush3.msra.mxu1 %v659_v13  ;;  %2104 = vmatprep.subr.mxu0 %v842_v16 }
  0x46   : > { %2080 = vmatprep.subr.mxu1 %v658_v15  ;;  %2105 = vmatpush3.msra.mxu0 %v842_v16 }
  0x47   : > { %2081 = vmatpush3.msra.mxu1 %v658_v15  ;;  %2106 = vmatprep.subr.mxu0 %v841_v18 }
  0x48   : > { %2082 = vmatprep.subr.mxu1 %v657_v17  ;;  %2107 = vmatpush3.msra.mxu0 %v841_v18 }
  0x49   : > { %2083 = vmatpush3.msra.mxu1 %v657_v17  ;;  %2108 = vmatprep.subr.mxu0 %v840_v20 }
  0x4a   : > { %2084 = vmatprep.subr.mxu1 %v656_v19  ;;  %2109 = vmatpush3.msra.mxu0 %v840_v20 }
  0x4b   : > { %2085 = vmatpush3.msra.mxu1 %v656_v19  ;;  %2110 = vmatprep.subr.mxu0 %v839_v21 }
  0x4c   : > { %2111 = vmatpush3.msra.mxu0 %v839_v21  ;;  %2115 = vmatprep.subr.mxu1 %v2358_v22 }
  0x4d   : > { %2126 = vmatprep.subr.mxu0 %v2358_v22 }
  0xfb   : > { %v2069_v24 = vpop.f32.mrf.mxu1 }
  0xfc   : > { %v651_v26 = vadd.f32 %v2069_v24, %v1926_v23  ;;  %v2095_v28 = vpop.f32.mrf.mxu0 }
  0xfd   : > { %v645_v27 = vpop.f32.mrf.mxu1  ;;  %v834_v30 = vadd.f32 %v2095_v28, %v1932_v25 }
  0xfe   : > { %v646_v29 = vadd.f32 %v1926_v23, %v645_v27  ;;  %v828_v31 = vpop.f32.mrf.mxu0  ;;  %v655_v34 = vmax.f32 %v651_v26, 0.0 }
  0xff   : > { %v829_v33 = vadd.f32 %v1932_v25, %v828_v31  ;;  %v838_v35 = vmax.f32 %v834_v30, 0.0 }
 0x100   : > { %v654_v32 = vmax.f32 %v646_v29, 0.0 }
 0x101   : > { %v837_v36 = vmax.f32 %v829_v33, 0.0 }
 0x102   : > { %2086 = vmatprep.mubr.msk.f32.mxu1 %vm671_vm3, %v654_v32 }
 0x103   : > { %2087 = vmatmul.mubr.msk.f32.vlgmr.msra.gmra.mxu1 %vm671_vm3, %v655_v34  ;;  %2112 = vmatprep.mubr.msk.f32.mxu0 %vm671_vm3, %v837_v36 }
 0x104   : > { %2116 = vmatpush3.msra.mxu1 %v938_v37  ;;  %2113 = vmatmul.mubr.msk.f32.vlgmr.msra.gmra.mxu0 %vm671_vm3, %v838_v35 }
 0x105   : > { %2117 = vmatprep.subr.mxu1 %v2358_v22  ;;  %2127 = vmatpush3.msra.mxu0 %v938_v37 }
 0x106   : > { %2118 = vmatpush3.msra.mxu1 %v937_v38  ;;  %2128 = vmatprep.subr.mxu0 %v2358_v22 }
 0x107   : > { %2119 = vmatprep.subr.mxu1 %v2358_v22  ;;  %2129 = vmatpush3.msra.mxu0 %v937_v38 }
 0x108   : > { %2120 = vmatpush3.msra.mxu1 %v936_v39  ;;  %2130 = vmatprep.subr.mxu0 %v2358_v22 }
 0x109   : > { %2121 = vmatprep.subr.mxu1 %v2358_v22  ;;  %2131 = vmatpush3.msra.mxu0 %v936_v39 }
 0x10a   : > { %2132 = vmatprep.subr.mxu0 %v2358_v22  ;;  %2122 = vmatpush3.msra.mxu1 %v935_v40 }
 0x10b   : > { %2133 = vmatpush3.msra.mxu0 %v935_v40  ;;  %2134 = vmatprep.mubr.msk.f32.mxu0 %vm2359_vm4, %v2358_v22 }
 0x10c   : > { %2148 = vmatprep.subr.mxu0 %v2358_v22  ;;  %2123 = vmatprep.mubr.msk.f32.mxu1 %vm2359_vm4, %v2358_v22 }
 0x10d   : > { %2137 = vmatprep.subr.mxu1 %v2358_v22 }
 0x1c3   : > { %v2088_v42 = vpop.f32.mrf.mxu1 }
 0x1c4   : > { %v750_v43 = vadd.f32 %v2088_v42, %v1929_v41  ;;  %v2114_v48 = vpop.f32.mrf.mxu0 }
 0x1c5   : > { %v744_v45 = vpop.f32.mrf.mxu1  ;;  %v932_v53 = vadd.f32 %v2114_v48, %v1935_v50 }
 0x1c6   : > { %v745_v46 = vadd.f32 %v1929_v41, %v744_v45  ;;  %2135 = vmatmul.mubr.msk.f32.vlgmr.msra.gmra.mxu0 %vm939_vm5, %v750_v43  ;;  %v926_v52 = vpop.f32.mrf.mxu0 }
 0x1c7   : > { %2149 = vmatpush3.msra.mxu0 %v1095_v44  ;;  %2156 = vmatprep.mubr.msk.f32.mxu0 %vm2359_vm4, %v2358_v22  ;;  %v927_v54 = vadd.f32 %v1935_v50, %v926_v52 }
 0x1c8   : > { %2150 = vmatprep.subr.mxu0 %v2358_v22  ;;  %2124 = vmatmul.mubr.msk.f32.vlgmr.msra.gmra.mxu1 %vm939_vm5, %v745_v46 }
 0x1c9   : > { %2138 = vmatpush3.msra.mxu1 %v1095_v44  ;;  %2151 = vmatpush3.msra.mxu0 %v1094_v47 }
 0x1ca   : > { %2139 = vmatprep.subr.mxu1 %v2358_v22  ;;  %2152 = vmatprep.subr.mxu0 %v2358_v22 }
 0x1cb   : > { %2140 = vmatpush3.msra.mxu1 %v1094_v47  ;;  %2153 = vmatpush3.msra.mxu0 %v1093_v49 }
 0x1cc   : > { %2141 = vmatprep.subr.mxu1 %v2358_v22  ;;  %2154 = vmatprep.subr.mxu0 %v2358_v22 }
 0x1cd   : > { %2142 = vmatpush3.msra.mxu1 %v1093_v49  ;;  %2155 = vmatpush3.msra.mxu0 %v1092_v51 }
 0x1ce   : > { %2143 = vmatprep.subr.mxu1 %v2358_v22  ;;  %2157 = vmatmul.mubr.msk.f32.vlgmr.msra.gmra.mxu0 %vm939_vm5, %v932_v53 }
 0x1cf   : > { %2144 = vmatpush3.msra.mxu1 %v1092_v51  ;;  %2145 = vmatprep.mubr.msk.f32.mxu1 %vm2359_vm4, %v2358_v22 }
 0x1d0   : > { %2146 = vmatmul.mubr.msk.f32.vlgmr.msra.gmra.mxu1 %vm939_vm5, %v927_v54 }
 0x286   : > { %v1082_v55 = vpop.f32.mrf.mxu0 }
 0x287   : > { %1087 = vrot.lane.b32.xlu0 %v1082_v55, %s2360_s28 }
 0x288   : > { %v1009_v56 = vpop.f32.mrf.mxu1  ;;  %v2136_v57 = vpop.f32.mrf.mxu0 }
 0x28a   : > { %v2125_v58 = vpop.f32.mrf.mxu1 }
 0x28e   : > { %v1238_v59 = vpop.f32.mrf.mxu0 }
 0x28f   : > { %1243 = vrot.lane.b32.xlu0 %v1238_v59, %s2360_s28 }
 0x290   : > { %v1165_v60 = vpop.f32.mrf.mxu1  ;;  %v2158_v61 = vpop.f32.mrf.mxu0 }
 0x292   : > { %v2147_v62 = vpop.f32.mrf.mxu1 }
 0x2f9   : > { %v1088_v63 = vpop.permute.xlu0 %1087 }
 0x2fa   : > { %v1090_v0 = vsel %vm671_vm3, %v1009_v56, %v1088_v63 }
 0x2fb   : > { %1091 = vst [vmem:[#allocation2] sm:$0xff] %v1090_v0 }
 0x301   : > { %v1244_v1 = vpop.permute.xlu0 %1243 }
 0x302   : > { %v1246_v2 = vsel %vm671_vm3, %v1165_v60, %v1244_v1 }
 0x303   : > { %1247 = vst [vmem:[#allocation3] sm:$0xff] %v1246_v2 }
 0x304 PF: > { %v1295_v3 = vld [vmem:[#allocation2] sm:$0xff]  ;;  %v1252_v4 = vlaneseq  ;;  %v1393_v5 = vld [vmem:[%s2919_s15 + $0x78] sm:$0xff]  ;;  %v2361_v6 = vmov 0.0   ;;  %vm2362_vm6 = vmmov 0   ;;  %v2647_v7 = vstv %s2489_s5  ;;  %s2938_s24 = sld [smem:[#allocation14_spill]]  ;;  %v1392_v11 = vld [vmem:[%s2919_s15 + $0x70] sm:$0xff] }
 0x305   : > { %2159 = vmatprep.subr.mxu0 %v2361_v6  ;;  %2161 = vmatprep.mubr.msk.f32.mxu0 %vm2362_vm6, %v2361_v6  ;;  %v1391_v13 = vld [vmem:[%s2919_s15 + $0x68] sm:$0xff]  ;;  %v1390_v16 = vld [vmem:[%s2919_s15 + $0x60] sm:$0xff]  ;;  %vm1303_vm13 = vcmask 64512   ;;  %v1389_v17 = vld [vmem:[%s2919_s15 + $0x58] sm:$0xff]  ;;  %v2767_v42 = vstv %s2492_s29  ;;  %p1957_p0 = scmp.ne.s32.totalorder %s2484_s14, 6 }
 0x306   : > { %2160 = vmatpush3.msra.mxu0 %v1295_v3  ;;  %v2649_v8 = vand.u32 127, %v1252_v4  ;;  %v2651_v9 = vshrl.u32 %v1252_v4, 7  ;;  %2164 = vmatprep.subr.mxu1 %v2361_v6  ;;  %v1388_v19 = vld [vmem:[%s2919_s15 + $0x50] sm:$0xff]  ;;  %v1387_v20 = vld [vmem:[%s2919_s15 + $0x48] sm:$0xff]  ;;  %v1386_v21 = vld [vmem:[%s2919_s15 + $0x40] sm:$0xff] }
 0x307   : > { %2165 = vmatpush3.msra.mxu1 %v1393_v5  ;;  %2196 = vmatprep.mubr.msk.f32.mxu1 %vm2362_vm6, %v2361_v6  ;;  %v1385_v22 = vld [vmem:[%s2919_s15 + $0x38] sm:$0xff]  ;;  %v1384_v23 = vld [vmem:[%s2919_s15 + $0x30] sm:$0xff]  ;;  %v1383_v24 = vld [vmem:[%s2919_s15 + $0x28] sm:$0xff] }
 0x308   : > { %vm1262_vm7 = vcmp.lt.s32.totalorder %v2649_v8, %v2647_v7  ;;  %vm1264_vm8 = vcmp.lt.s32.totalorder %v2651_v9, 3  ;;  %v1943_v12 = vadd.s32 4294967293, %v2651_v9  ;;  %vm1268_vm9 = vcmp.ge.s32.totalorder %v2651_v9, 3  ;;  %2166 = vmatprep.subr.mxu1 %v2361_v6  ;;  %2199 = vmatprep.subr.mxu0 %v2361_v6  ;;  %v1382_v25 = vld [vmem:[%s2919_s15 + $0x20] sm:$0xff]  ;;  %v1381_v26 = vld [vmem:[%s2919_s15 + $0x18] sm:$0xff]  ;;  %v1380_v27 = vld [vmem:[%s2919_s15 + $0x10] sm:$0xff] }
 0x309   : > { %vm1269_vm10 = vcmp.eq.s32.totalorder %v2649_v8, %v2647_v7  ;;  %2167 = vmatpush3.msra.mxu1 %v1392_v11  ;;  %v1379_v28 = vld [vmem:[%s2919_s15 + $0x8] sm:$0xff]  ;;  %v1378_v29 = vld [vmem:[%s2919_s15] sm:$0xff]  ;;  %v1625_v35 = vld [vmem:[%s2921_s17 + $0x38] sm:$0xff]  ;;  %vm1275_vm15 = vcmp.lt.s32.totalorder %v2651_v9, %v2767_v42  ;;  %vm1276_vm0 = vcmp.lt.s32.totalorder %v2649_v8, %v2767_v42  ;;  %v1280_v43 = vadd.s32 3, %v2651_v9 }
 0x30a   : > { %v1942_v10 = vld [vmem:[%s2938_s24] ss:$0 sm:$0xff]  ;;  %v1266_v15 = vsel %vm1264_vm8, %v2651_v9, %v1943_v12  ;;  %vm1270_vm11 = vmand %vm1268_vm9, %vm1269_vm10  ;;  %2168 = vmatprep.subr.mxu1 %v2361_v6  ;;  %s2939_s24 = sld [smem:[#allocation18_spill]]  ;;  %v1624_v36 = vld [vmem:[%s2921_s17 + $0x30] sm:$0xff]  ;;  %vm1278_vm2 = vcmp.ne.s32.totalorder %v2649_v8, %v2651_v9  ;;  %vm1287_vm10 = vcmp.eq.s32.totalorder %v2649_v8, 6 }
 0x30b   : > { %v1263_v14 = vsel %vm1262_vm7, %v1942_v10, 4294967295  ;;  %2169 = vmatpush3.msra.mxu1 %v1391_v13  ;;  %v1623_v37 = vld [vmem:[%s2921_s17 + $0x28] sm:$0xff]  ;;  %v1622_v38 = vld [vmem:[%s2921_s17 + $0x20] sm:$0xff]  ;;  %v1621_v39 = vld [vmem:[%s2921_s17 + $0x18] sm:$0xff]  ;;  %vm1281_vm3 = vcmp.eq.s32.totalorder %v2649_v8, %v1280_v43  ;;  %vm1284_vm7 = vcmp.eq.s32.totalorder %v2651_v9, %v2767_v42  ;;  %v1628_v10 = vsub.s32 0, %v2651_v9 }
 0x30c   : > { %vm1267_vm12 = vcmp.eq.s32.totalorder %v1263_v14, %v1266_v15  ;;  %2170 = vmatprep.subr.mxu1 %v2361_v6  ;;  %v1620_v40 = vld [vmem:[%s2921_s17 + $0x10] sm:$0xff]  ;;  %v1619_v41 = vld [vmem:[%s2921_s17 + $0x8] sm:$0xff]  ;;  %vm1277_vm1 = vmand %vm1275_vm15, %vm1276_vm0 }
 0x30d   : > { %vm1271_vm14 = vmor %vm1267_vm12, %vm1270_vm11  ;;  %2171 = vmatpush3.msra.mxu1 %v1390_v16  ;;  %v1949_v44 = vld [vmem:[%s2920_s16] ss:$0 sm:$0xff]  ;;  %v1544_v49 = vld [vmem:[#allocation3] sm:$0xff] }
 0x30e   : > { %v1944_v18 = vsel %vm1271_vm14, 1.0, %v2361_v6  ;;  %2172 = vmatprep.subr.mxu1 %v2361_v6  ;;  %vm1279_vm4 = vmand %vm1277_vm1, %vm1278_vm2  ;;  %v1618_v51 = vld [vmem:[%s2921_s17] sm:$0xff]  ;;  %v1728_v52 = vld [vmem:[%s2923_s19 + $0x78] sm:$0xff] }
 0x30f   : > { %2162 = vmatmul.mubr.msk.f32.vlgmr.msra.gmra.mxu0 %vm1303_vm13, %v1944_v18  ;;  %2173 = vmatpush3.msra.mxu1 %v1389_v17  ;;  %vm1282_vm5 = vmand %vm1275_vm15, %vm1281_vm3  ;;  %vm1292_vm15 = vcmp.gt.s32.totalorder %v2649_v8, %v2647_v7  ;;  %v1727_v53 = vld [vmem:[%s2923_s19 + $0x70] sm:$0xff]  ;;  %v1726_v54 = vld [vmem:[%s2923_s19 + $0x68] sm:$0xff]  ;;  %vm1837_vm3 = vcmask 8192  }
 0x310   : > { %2201 = vmatprep.mubr.msk.f32.mxu0 %vm2362_vm6, %v2361_v6  ;;  %2174 = vmatprep.subr.mxu1 %v2361_v6  ;;  %v1947_v30 = vld [vmem:[%s2939_s24] ss:$0 sm:$0xff]  ;;  %vm1283_vm8 = vmor %vm1279_vm4, %vm1282_vm5  ;;  %v1946_v50 = vsel %vm1292_vm15, 1.0, %v2361_v6  ;;  %v1724_v56 = vld [vmem:[%s2923_s19 + $0x58] sm:$0xff] }
 0x311   : > { %2175 = vmatpush3.msra.mxu1 %v1388_v19  ;;  %vm1285_vm9 = vmand %vm1284_vm7, %vm1276_vm0  ;;  %v1725_v55 = vld [vmem:[%s2923_s19 + $0x60] sm:$0xff]  ;;  %v1723_v57 = vld [vmem:[%s2923_s19 + $0x50] sm:$0xff]  ;;  %vm1802_vm0 = vcmask 15360  }
 0x312   : > { %2176 = vmatprep.subr.mxu1 %v2361_v6  ;;  %vm1286_vm11 = vmor %vm1283_vm8, %vm1285_vm9  ;;  %v1722_v58 = vld [vmem:[%s2923_s19 + $0x48] sm:$0xff]  ;;  %v1721_v59 = vld [vmem:[%s2923_s19 + $0x40] sm:$0xff] }
 0x313   : > { %2177 = vmatpush3.msra.mxu1 %v1387_v20  ;;  %vm1288_vm12 = vmand %vm1284_vm7, %vm1287_vm10  ;;  %v1720_v60 = vld [vmem:[%s2923_s19 + $0x38] sm:$0xff]  ;;  %v1719_v61 = vld [vmem:[%s2923_s19 + $0x30] sm:$0xff] }
 0x314   : > { %2178 = vmatprep.subr.mxu1 %v2361_v6  ;;  %vm1289_vm14 = vmor %vm1286_vm11, %vm1288_vm12  ;;  %v1718_v62 = vld [vmem:[%s2923_s19 + $0x28] sm:$0xff]  ;;  %v1717_v63 = vld [vmem:[%s2923_s19 + $0x20] sm:$0xff] }
 0x315   : > { %2179 = vmatpush3.msra.mxu1 %v1386_v21  ;;  %v1945_v47 = vsel %vm1289_vm14, 1.0, %v2361_v6  ;;  %v1716_v4 = vld [vmem:[%s2923_s19 + $0x18] sm:$0xff]  ;;  %v1715_v5 = vld [vmem:[%s2923_s19 + $0x10] sm:$0xff]  ;;  %v1714_v7 = vld [vmem:[%s2923_s19 + $0x8] sm:$0xff] }
 0x316   : > { %2180 = vmatprep.subr.mxu1 %v2361_v6  ;;  %v1713_v8 = vld [vmem:[%s2923_s19] sm:$0xff] }
 0x317   : > { %2181 = vmatpush3.msra.mxu1 %v1385_v22  ;;  %v1953_v13 = vld [vmem:[%s2922_s18] ss:$0 sm:$0xff] }
 0x318   : > { %2182 = vmatprep.subr.mxu1 %v2361_v6 }
 0x319   : > { %2183 = vmatpush3.msra.mxu1 %v1384_v23 }
 0x31a   : > { %2184 = vmatprep.subr.mxu1 %v2361_v6 }
 0x31b   : > { %2185 = vmatpush3.msra.mxu1 %v1383_v24 }
 0x31c   : > { %2186 = vmatprep.subr.mxu1 %v2361_v6 }
 0x31d   : > { %2187 = vmatpush3.msra.mxu1 %v1382_v25 }
 0x31e   : > { %2188 = vmatprep.subr.mxu1 %v2361_v6 }
 0x31f   : > { %2189 = vmatpush3.msra.mxu1 %v1381_v26 }
 0x320   : > { %2190 = vmatprep.subr.mxu1 %v2361_v6 }
 0x321   : > { %2191 = vmatpush3.msra.mxu1 %v1380_v27 }
 0x322   : > { %2192 = vmatprep.subr.mxu1 %v2361_v6 }
 0x323   : > { %2193 = vmatpush3.msra.mxu1 %v1379_v28 }
 0x324   : > { %2194 = vmatprep.subr.mxu1 %v2361_v6 }
 0x325   : > { %2195 = vmatpush3.msra.mxu1 %v1378_v29 }
 0x326   : > { %2209 = vmatprep.subr.mxu1 %v2361_v6 }
 0x3cf   : > { %v1373_v31 = vpop.f32.mrf.mxu0 }
 0x3d0   : > { %v1374_v32 = vadd.f32 %v1947_v30, %v1373_v31 }
 0x3d1   : > { %v2163_v33 = vpop.f32.mrf.mxu0 }
 0x3d2   : > { %v1377_v34 = vmax.f32 %v1374_v32, 0.0 }
 0x3d4   : > { %2197 = vmatmul.mubr.f32.vlgmr.msra.gmra.mxu1 %v1377_v34 }
 0x3d5   : > { %2225 = vmatprep.mubr.msk.f32.mxu1 %vm2362_vm6, %v2361_v6  ;;  %2210 = vmatpush3.msra.mxu1 %v1625_v35 }
 0x3d6   : > { %2211 = vmatprep.subr.mxu1 %v2361_v6 }
 0x3d7   : > { %2212 = vmatpush3.msra.mxu1 %v1624_v36 }
 0x3d8   : > { %2213 = vmatprep.subr.mxu1 %v2361_v6 }
 0x3d9   : > { %2214 = vmatpush3.msra.mxu1 %v1623_v37 }
 0x3da   : > { %2215 = vmatprep.subr.mxu1 %v2361_v6 }
 0x3db   : > { %2216 = vmatpush3.msra.mxu1 %v1622_v38 }
 0x3dc   : > { %2217 = vmatprep.subr.mxu1 %v2361_v6 }
 0x3dd   : > { %2218 = vmatpush3.msra.mxu1 %v1621_v39  ;;  %v1823_v39 = vstv %s2495_s30  ;;  %s1962_s30 = scalar_lea.vmem [#allocation5], %s2354_s1 }
 0x3de   : > { %2219 = vmatprep.subr.mxu1 %v2361_v6  ;;  %vm1824_vm1 = vcmp.eq.s32.totalorder %v2651_v9, %v1823_v39 }
 0x3df   : > { %2220 = vmatpush3.msra.mxu1 %v1620_v40  ;;  %v1954_v43 = vsel %vm1824_vm1, 1.0, %v2361_v6 }
 0x3e0   : > { %2221 = vmatprep.subr.mxu1 %v2361_v6 }
 0x3e1   : > { %2222 = vmatpush3.msra.mxu1 %v1619_v41 }
 0x3e2   : > { %2223 = vmatprep.subr.mxu1 %v2361_v6 }
 0x3e3   : > { %2224 = vmatpush3.msra.mxu1 %v1618_v51 }
 0x494   : > { %v1467_v45 = vpop.f32.mrf.mxu1 }
 0x495   : > { %v1468_v46 = vadd.f32 %v1949_v44, %v1467_v45 }
 0x496   : > { %v2198_v48 = vpop.f32.mrf.mxu1 }
 0x497   : > { %2200 = vmatpush3.msra.mxu0 %v1468_v46 }
 0x498   : > { %2202 = vmatmul.mubr.msk.f32.vlgmr.msra.gmra.mxu0 %vm1303_vm13, %v1945_v47  ;;  %2204 = vmatprep.subr.mxu0 %v2361_v6 }
 0x499   : > { %2205 = vmatpush3.msra.mxu0 %v1544_v49  ;;  %2206 = vmatprep.mubr.msk.f32.mxu0 %vm2362_vm6, %v2361_v6 }
 0x49a   : > { %2228 = vmatprep.subr.mxu0 %v2361_v6 }
 0x49c   : > { %2207 = vmatmul.mubr.msk.f32.vlgmr.msra.gmra.mxu0 %vm1303_vm13, %v1946_v50  ;;  %vm1799_vm13 = vcmp.le.s32.totalorder %v2651_v9, %v2767_v42 }
 0x49d   : > { %2260 = vmatprep.mubr.msk.f32.mxu0 %vm2362_vm6, %v2361_v6  ;;  %2229 = vmatpush3.msra.mxu0 %v1728_v52  ;;  %vm1630_vm6 = vcmask 523264  }
 0x49e   : > { %2230 = vmatprep.subr.mxu0 %v2361_v6 }
 0x49f   : > { %2231 = vmatpush3.msra.mxu0 %v1727_v53 }
 0x4a0   : > { %2232 = vmatprep.subr.mxu0 %v2361_v6 }
 0x4a1   : > { %2233 = vmatpush3.msra.mxu0 %v1726_v54 }
 0x4a2   : > { %2234 = vmatprep.subr.mxu0 %v2361_v6 }
 0x4a3   : > { %2235 = vmatpush3.msra.mxu0 %v1725_v55 }
 0x4a4   : > { %2236 = vmatprep.subr.mxu0 %v2361_v6 }
 0x4a5   : > { %2237 = vmatpush3.msra.mxu0 %v1724_v56 }
 0x4a6   : > { %2238 = vmatprep.subr.mxu0 %v2361_v6 }
 0x4a7   : > { %2239 = vmatpush3.msra.mxu0 %v1723_v57 }
 0x4a8   : > { %2240 = vmatprep.subr.mxu0 %v2361_v6 }
 0x4a9   : > { %2241 = vmatpush3.msra.mxu0 %v1722_v58 }
 0x4aa   : > { %2242 = vmatprep.subr.mxu0 %v2361_v6 }
 0x4ab   : > { %2243 = vmatpush3.msra.mxu0 %v1721_v59  ;;  %v1827_v59 = vld [vmem:[#allocation4] sm:$0x1] }
 0x4ac   : > { %2244 = vmatprep.subr.mxu0 %v2361_v6 }
 0x4ad   : > { %2245 = vmatpush3.msra.mxu0 %v1720_v60 }
 0x4ae   : > { %2246 = vmatprep.subr.mxu0 %v2361_v6 }
 0x4af   : > { %2247 = vmatpush3.msra.mxu0 %v1719_v61 }
 0x4b0   : > { %2248 = vmatprep.subr.mxu0 %v2361_v6 }
 0x4b1   : > { %2249 = vmatpush3.msra.mxu0 %v1718_v62 }
 0x4b2   : > { %2250 = vmatprep.subr.mxu0 %v2361_v6 }
 0x4b3   : > { %2251 = vmatpush3.msra.mxu0 %v1717_v63 }
 0x4b4   : > { %2252 = vmatprep.subr.mxu0 %v2361_v6 }
 0x4b5   : > { %2253 = vmatpush3.msra.mxu0 %v1716_v4 }
 0x4b6   : > { %2254 = vmatprep.subr.mxu0 %v2361_v6 }
 0x4b7   : > { %2255 = vmatpush3.msra.mxu0 %v1715_v5 }
 0x4b8   : > { %2256 = vmatprep.subr.mxu0 %v2361_v6 }
 0x4b9   : > { %2257 = vmatpush3.msra.mxu0 %v1714_v7 }
 0x4ba   : > { %2258 = vmatprep.subr.mxu0 %v2361_v6 }
 0x4bb   : > { %2259 = vmatpush3.msra.mxu0 %v1713_v8 }
 0x558   : > { %v1540_v0 = vpop.f32.mrf.mxu0 }
 0x559   : > { %2226 = vmatmul.mubr.msk.f32.vlgmr.msra.gmra.mxu1 %vm1630_vm6, %v1540_v0 }
 0x55a   : > { %v2203_v1 = vpop.f32.mrf.mxu0 }
 0x55c   : > { %v1614_v2 = vpop.f32.mrf.mxu0 }
 0x55d   : > { %v1629_v11 = vrot.slane %v1614_v2, %v1628_v10 }
 0x55e   : > { %v2208_v3 = vpop.f32.mrf.mxu0 }
 0x619   : > { %v1700_v12 = vpop.f32.mrf.mxu1 }
 0x61a   : > { %v1701_v14 = vadd.f32 %v1700_v12, %v1629_v11 }
 0x61b   : > { %v2227_v15 = vpop.f32.mrf.mxu1 }
 0x61c   : > { %v1711_v16 = vadd.f32 %v1953_v13, %v1701_v14 }
 0x61e   : > { %v1712_v17 = vmax.f32 %v1711_v16, 0.0 }
 0x620   : > { %2261 = vmatmul.mubr.f32.vlgmr.msra.gmra.mxu0 %v1712_v17 }
 0x6e0   : > { %v1795_v18 = vpop.f32.mrf.mxu0 }
 0x6e1   : > { %v1800_v19 = vsub.f32 0.0, %v1795_v18 }
 0x6e2   : > { %v2262_v20 = vpop.f32.mrf.mxu0 }
 0x6e3   : > { %v1801_v21 = vsel %vm1799_vm13, %v1800_v19, -1e+30 }
 0x6e4   : > { %v1803_v22 = vsel %vm1802_vm0, %v1801_v21, -inf }
 0x6e5   : > { %v1804_v23 = vrot.slane %v1803_v22, 4 }
 0x6e7   : > { %v1805_v24 = vmax.f32 %v1803_v22, %v1804_v23 }
 0x6e9   : > { %v1806_v25 = vrot.slane %v1805_v24, 2 }
 0x6eb   : > { %v1807_v26 = vmax.f32 %v1805_v24, %v1806_v25 }
 0x6ed   : > { %v1808_v27 = vrot.slane %v1807_v26, 1 }
 0x6ef   : > { %v1809_v28 = vmax.f32 %v1807_v26, %v1808_v27 }
 0x6f1   : > { %v1810_v29 = vsub.f32 %v1801_v21, %v1809_v28 }
 0x6f3   : > { %v1811_v30 = vmul.f32 1.442695, %v1810_v29 }
 0x6f5   : > { %2288 = vpow2.f32 %v1811_v30 }
 0x702   : > { %v2289_v31 = vpop.eup %2288 }
 0x703   : > { %v1813_v32 = vsel %vm1802_vm0, %v2289_v31, 0.0 }
 0x704   : > { %v1814_v33 = vrot.slane %v1813_v32, 4 }
 0x706   : > { %v1815_v34 = vadd.f32 %v1814_v33, %v1813_v32 }
 0x708   : > { %v1816_v35 = vrot.slane %v1815_v34, 2 }
 0x70a   : > { %v1817_v36 = vadd.f32 %v1816_v35, %v1815_v34 }
 0x70c   : > { %v1818_v37 = vrot.slane %v1817_v36, 1 }
 0x70e   : > { %v1819_v38 = vadd.f32 %v1818_v37, %v1817_v36 }
 0x710   : > { %2290 = vlog2.f32 %v1819_v38 }
 0x71d   : > { %v2291_v40 = vpop.eup %2290 }
 0x71e   : > { %v1821_v41 = vmul.f32 0.6931472, %v2291_v40 }
 0x720   : > { %v1822_v44 = vsub.f32 %v1810_v29, %v1821_v41 }
 0x722   : > { %v1828_v45 = vmul.f32 %v1954_v43, %v1822_v44  ;;  %v1839_v46 = vsel %vm1802_vm0, %v1822_v44, -inf }
 0x723   : > { %v1840_v47 = vrot.slane %v1839_v46, 4 }
 0x724   : > { %v1829_v48 = vsel %vm1802_vm0, %v1828_v45, 0.0 }
 0x725   : > { %v1830_v49 = vrot.slane %v1829_v48, 4  ;;  %v1841_v50 = vmax.f32 %v1839_v46, %v1840_v47 }
 0x727   : > { %v1831_v51 = vadd.f32 %v1830_v49, %v1829_v48  ;;  %v1842_v52 = vrot.slane %v1841_v50, 2 }
 0x729   : > { %v1832_v53 = vrot.slane %v1831_v51, 2  ;;  %v1843_v54 = vmax.f32 %v1841_v50, %v1842_v52 }
 0x72b   : > { %v1833_v55 = vadd.f32 %v1832_v53, %v1831_v51  ;;  %v1844_v56 = vrot.slane %v1843_v54, 1 }
 0x72d   : > { %v1834_v57 = vrot.slane %v1833_v55, 1  ;;  %v1845_v58 = vmax.f32 %v1843_v54, %v1844_v56 }
 0x72f   : > { %v1835_v60 = vadd.f32 %v1834_v57, %v1833_v55  ;;  %vm1846_vm2 = vcmp.eq.f32.partialorder %v1822_v44, %v1845_v58 }
 0x730   : > { %v1847_v6 = vsel %vm1846_vm2, %v2651_v9, 9 }
 0x731   : > { %v1836_v61 = vsub.f32 %v1827_v59, %v1835_v60  ;;  %v1848_v62 = vsel %vm1802_vm0, %v1847_v6, 2147483647 }
 0x732   : > { %v1849_v63 = vrot.slane %v1848_v62, 4 }
 0x733   : > { %1838 = vst.msk [vmem:[#allocation4] sm:$0x1] %vm1837_vm3, %v1836_v61 }
 0x734   : > { %vm1850_vm4 = vcmp.lt.s32.totalorder %v1848_v62, %v1849_v63 }
 0x735   : > { %v1851_v0 = vsel %vm1850_vm4, %v1848_v62, %v1849_v63 }
 0x736   : > { %v1852_v1 = vrot.slane %v1851_v0, 2 }
 0x738   : > { %vm1853_vm5 = vcmp.lt.s32.totalorder %v1851_v0, %v1852_v1 }
 0x739   : > { %v1854_v2 = vsel %vm1853_vm5, %v1851_v0, %v1852_v1 }
 0x73a   : > { %v1855_v3 = vrot.slane %v1854_v2, 1 }
 0x73c   : > { %vm1856_vm7 = vcmp.lt.s32.totalorder %v1854_v2, %v1855_v3  ;;  %1864 = sbr.rel (%p1957_p0) target bundleno = 1892 (0x764), region = 100 }
 0x73d   : > { %v1857_v4 = vsel %vm1856_vm7, %v1854_v2, %v1855_v3 }
 0x73e   : > { %v1858_v5 = vcvt.s32.f32 %v1857_v4 }
 0x740   : > { %1965 = vst.msk [vmem:[%s1962_s30] sm:$0x1] %vm1837_vm3, %v1858_v5 }
 0x741   : > { %v1879_v7 = vld [vmem:[#allocation4] sm:$0x1]  ;;  %v1865_v8 = vmul.f32 1.442695, %v1822_v44  ;;  %v2363_v11 = vmov 0.0  }
 0x742   : > { %1877 = vst [vmem:[#allocation9] sm:$0xff] %v2363_v11  ;;  %1878 = vst [vmem:[#allocation9 + $0x8] sm:$0xff] %v2363_v11 }
 0x743   : > { %1880 = vst.msk [vmem:[#allocation9] sm:$0x1] %vm1837_vm3, %v1879_v7  ;;  %2292 = vpow2.f32 %v1865_v8 }
 0x747   : > { %v1882_v10 = vld [vmem:[#allocation5] sm:$0xff] }
 0x748   : > { %1883 = vst.msk [vmem:[#allocation9 + $0x2] sm:$0xff] %vm1802_vm0, %v1882_v10 }
 0x750   : > { %v2293_v12 = vpop.eup %2292 }
 0x751   : > { %v1867_v13 = vmul.f32 %v2293_v12, %v1822_v44 }
 0x753   : > { %v1868_v14 = vsel %vm1799_vm13, %v1867_v13, 0.0 }
 0x754   : > { %v1869_v15 = vsel %vm1802_vm0, %v1868_v14, 0.0 }
 0x755   : > { %v1870_v16 = vrot.slane %v1869_v15, 4 }
 0x757   : > { %v1871_v17 = vadd.f32 %v1870_v16, %v1869_v15 }
 0x759   : > { %v1872_v18 = vrot.slane %v1871_v17, 2 }
 0x75b   : > { %v1873_v19 = vadd.f32 %v1872_v18, %v1871_v17 }
 0x75d   : > { %v1874_v20 = vrot.slane %v1873_v19, 1 }
 0x75f   : > { %v1875_v21 = vadd.f32 %v1874_v20, %v1873_v19 }
 0x761   : > { %v1876_v22 = vsub.f32 0.0, %v1875_v21 }
 0x763   : > { %1881 = vst.msk [vmem:[#allocation9 + $0x1] sm:$0x1] %vm1837_vm3, %v1876_v22 }
 0x764 PF: > { %p2267_p1 = scmp.eq.s32.totalorder %s2484_s14, 6  ;;  %s2364_s27 = smov [#allocation9]  }
 0x765   : > { %s1890_s28 = sshll.u32 %s2364_s27, 4  ;;  %s1891_s28 = int_to_ptr.vmem [resolvable:$true] %s1890_s28 }
 0x766   : > { %s2318_s0 = scalar_lea.vmem %s1891_s28, 256  ;;  %p2325_p5 = scmp.lt.s32.totalorder %s1891_s28, %s1891_s28 }
 0x767   : > { %p2319_p2 = scmp.ne.s32.totalorder %s1891_s28, %s2318_s0  ;;  %p2326_p6 = scmp.lt.s32.totalorder %s2318_s0, %s2318_s0 }
 0x769   : > { %p2320_p3 = pnand %p2319_p2, %p2267_p1  ;;  %p2327_p7 = por %p2326_p6, %p2325_p5 }
 0x76b   : > { %p2321_p4 = pneg %p2320_p3 }
 0x76d   : > { %p2328_p8 = pnand %p2327_p7, %p2321_p4 }
 0x76f   : > { %2331 = shalt.err (!%p2328_p8)
}
 0x770   : > { %s2365_s21 = smov 128   ;;  %s2366_s22 = smov 8  }
 0x771   : > { %2264 = dma.vmem_to_hbm [thread:$0]  (%p2267_p1), %s1891_s28, 256, %s2924_s20, [#allocation10], %s2365_s21, %s2365_s21, %s2366_s22  }
 0x772   : > { %2349 = dma.done.wait (%p2267_p1), [#allocation10], 256  }
 0x773   : > { %2351 = vsyncadd (%p2267_p1), [#allocation10], 4294967040 }
 0x774 PF: > { %s41_s1 = sadd.s32 1, %s2354_s1  }
 0x775   : > { %p38_p9 = scmp.ge.s32.totalorder %s41_s1, 9  }
 0x777   :  { %40 = sbr.rel (!%p38_p9) target bundleno = 38 (0x26), region = 125 }
 0x77c   :  { %1906 = vsyncpa [#allocation10], 1 }
 0x77d   :  { %1908 = vsyncpa [#allocation10 + $0x1], 1 }

</bundles_post_ra>
